<compile_context>
chip_gen: v6e
topology: v6e:2x2x1
jax: 0.10.0
libtpu: 0.0.40
codegen_flags: <defaults>
</compile_context>

<pallas_src>
import math
from functools import partial

import jax
import jax.numpy as jnp
from jax.experimental import pallas as pl
from jax.experimental.pallas import tpu as pltpu


def _layernorm_t(x_t, w_col, b_col, eps=1e-5):
    """LayerNorm over the channel dim in channels-major layout: x_t is (C, N)."""
    mu = jnp.mean(x_t, axis=0, keepdims=True)
    var = jnp.mean((x_t - mu) ** 2, axis=0, keepdims=True)
    return (x_t - mu) * jax.lax.rsqrt(var + eps) * w_col + b_col


def _gelu_exact(x):
    # matches torch.nn.GELU() default (erf formulation)
    return 0.5 * x * (1.0 + jax.lax.erf(x * (1.0 / math.sqrt(2.0))))


def block_kernel(x_ref, ln1w_ref, ln1b_ref, wqkv_t_ref, wproj_t_ref, bproj_ref,
                 ln2w_ref, ln2b_ref, w1_t_ref, b1_ref, w2_t_ref, b2_ref,
                 o_ref, *, num_heads):
    _, N, C = x_ref.shape
    hd = C // num_heads

    # Channels-major activation slab (C, N): one 2-D XLU transpose at entry, one at
    # exit; every matmul below is then a lane-dense 2-D (or head-batched 3-D) MXU op.
    x_t = x_ref[0].T                                                    # (C, N) f32

    # ---- norm1 + multi-head attention ---------------------------------------
    xn_t = _layernorm_t(x_t, ln1w_ref[...], ln1b_ref[...])              # (C, N) f32

    # Fused QKV projection: single (3C, C) x (C, N) bf16 matmul, f32 accumulation.
    # (The attention scale is already folded into the Q rows of wqkv_t.)
    qkv_t = jnp.dot(wqkv_t_ref[...], xn_t.astype(jnp.bfloat16),
                    preferred_element_type=jnp.float32)                 # (3C, N) f32

    # Per-head split = static sublane slices (layout only, no per-head matmuls).
    # Q additionally needs (H, N, hd) orientation for the batched score matmul:
    # H small 2-D XLU transposes.  K / V stay transposed (H, hd, N).
    q_heads, k_heads, v_heads = [], [], []
    for h in range(num_heads):
        lo = h * hd
        q_heads.append(qkv_t[lo:lo + hd, :].T)                          # (N, hd)
        k_heads.append(qkv_t[C + lo:C + lo + hd, :])                    # (hd, N)
        v_heads.append(qkv_t[2 * C + lo:2 * C + lo + hd, :])            # (hd, N)
    q = jnp.stack(q_heads, axis=0).astype(jnp.bfloat16)                 # (H, N, hd)
    k_t = jnp.stack(k_heads, axis=0).astype(jnp.bfloat16)               # (H, hd, N)
    v_t = jnp.stack(v_heads, axis=0).astype(jnp.bfloat16)               # (H, hd, N)

    # Scores + softmax (f32 elementwise math), batched over heads on the MXU.
    s = jnp.einsum('hid,hdj->hij', q, k_t,
                   preferred_element_type=jnp.float32)                  # (H, N, N)
    s = s - jnp.max(s, axis=-1, keepdims=True)
    p = jnp.exp(s)

    # PV matmul with *unnormalized* probabilities; softmax normalization deferred
    # past the matmul (O(H*N*hd) multiplies instead of O(H*N^2)).
    ao_t = jnp.einsum('hej,hij->hei', v_t, p.astype(jnp.bfloat16),
                      preferred_element_type=jnp.float32)               # (H, hd, N)
    linv = pl.reciprocal(jnp.sum(p, axis=-1), approx=True)              # (H, N)
    ao_t = ao_t * linv[:, None, :]

    # Head concat = leading-dim concat (layout only), then ONE lane-dense
    # (C, C) x (C, N) output projection.
    ao_c = jnp.concatenate([ao_t[h] for h in range(num_heads)], axis=0)  # (C, N)
    attn_t = jnp.dot(wproj_t_ref[...], ao_c.astype(jnp.bfloat16),
                     preferred_element_type=jnp.float32) + bproj_ref[...]

    x1_t = x_t + attn_t                                                 # residual 1

    # ---- norm2 + MLP ---------------------------------------------------------
    xn2_t = _layernorm_t(x1_t, ln2w_ref[...], ln2b_ref[...])
    h1 = jnp.dot(w1_t_ref[...], xn2_t.astype(jnp.bfloat16),
                 preferred_element_type=jnp.float32) + b1_ref[...]      # (H_mlp, N)
    g = _gelu_exact(h1)
    h2 = jnp.dot(w2_t_ref[...], g.astype(jnp.bfloat16),
                 preferred_element_type=jnp.float32) + b2_ref[...]      # (C, N)

    o_ref[0] = (x1_t + h2).T                                            # residual 2 -> (N, C)


def _vmem_limit_bytes():
    """~3/4 of physical VMEM, capped at 100 MiB (v5e/v6e: ~96-100 MiB; v7x: ~48 MiB)."""
    try:
        cap = int(pltpu.get_tpu_info().vmem_capacity_bytes)
    except Exception:
        cap = 128 * 1024 * 1024
    return min((cap * 3) // 4, 100 * 1024 * 1024)


def prepare_params(params, *, num_heads):
    """One-time (hoisted out of the hot path) weight preparation: transpose to
    channels-major, fold the qk scale into the Q rows, cast matmul weights to bf16,
    reshape biases / LN params to broadcastable columns."""
    C = params["wproj"].shape[0]
    hd = C // num_heads
    scale = hd ** -0.5
    wqkv_t = params["wqkv"].T                      # (3C, C); rows = [q | k | v] out-features
    wqkv_t = wqkv_t.at[:C].multiply(scale)         # fold attention scale into Wq rows
    return {
        "ln1_w": params["ln1_w"].reshape(C, 1),
        "ln1_b": params["ln1_b"].reshape(C, 1),
        "wqkv_t": wqkv_t.astype(jnp.bfloat16),
        "wproj_t": params["wproj"].T.astype(jnp.bfloat16),   # (C, C)
        "bproj": params["bproj"].reshape(C, 1),
        "ln2_w": params["ln2_w"].reshape(C, 1),
        "ln2_b": params["ln2_b"].reshape(C, 1),
        "w1_t": params["w1"].T.astype(jnp.bfloat16),          # (H_mlp, C)
        "b1": params["b1"].reshape(-1, 1),
        "w2_t": params["w2"].T.astype(jnp.bfloat16),          # (C, H_mlp)
        "b2": params["b2"].reshape(C, 1),
    }


def block_forward(x, prep, *, num_heads):
    B, N, C = x.shape
    H_mlp = prep["w1_t"].shape[0]

    kern = partial(block_kernel, num_heads=num_heads)

    def const_spec(shape):
        # Constant index map: block never changes across the grid, so Pallas fetches
        # it once.  (pipeline_mode=pl.Buffered(1) would additionally drop the second
        # buffer - worthwhile at production weight sizes on v7x.)
        return pl.BlockSpec(shape, lambda b, _s=shape: (0,) * len(_s))

    in_specs = [
        pl.BlockSpec((1, N, C), lambda b: (b, 0, 0)),   # x (per-batch tile)
        const_spec((C, 1)),                             # ln1 weight (column)
        const_spec((C, 1)),                             # ln1 bias
        const_spec((3 * C, C)),                         # fused QKV weight^T (bf16, scale folded)
        const_spec((C, C)),                             # proj weight^T (bf16)
        const_spec((C, 1)),                             # proj bias
        const_spec((C, 1)),                             # ln2 weight
        const_spec((C, 1)),                             # ln2 bias
        const_spec((H_mlp, C)),                         # fc1 weight^T (bf16)
        const_spec((H_mlp, 1)),                         # fc1 bias
        const_spec((C, H_mlp)),                         # fc2 weight^T (bf16)
        const_spec((C, 1)),                             # fc2 bias
    ]

    return pl.pallas_call(
        kern,
        out_shape=jax.ShapeDtypeStruct((B, N, C), jnp.float32),
        grid=(B,),
        in_specs=in_specs,
        out_specs=pl.BlockSpec((1, N, C), lambda b: (b, 0, 0)),
        compiler_params=pltpu.CompilerParams(
            dimension_semantics=("parallel",),
            vmem_limit_bytes=_vmem_limit_bytes(),
        ),
    )(
        x,
        prep["ln1_w"], prep["ln1_b"],
        prep["wqkv_t"],
        prep["wproj_t"], prep["bproj"],
        prep["ln2_w"], prep["ln2_b"],
        prep["w1_t"], prep["b1"], prep["w2_t"], prep["b2"],
    )


def block_reference(x, params, *, num_heads):
    # pure-JAX f32 reference for correctness checking
    B, N, C = x.shape
    head_dim = C // num_heads
    scale = head_dim ** -0.5

    def ln(x, w, b):
        mu = jnp.mean(x, axis=-1, keepdims=True)
        var = jnp.mean((x - mu) ** 2, axis=-1, keepdims=True)
        return (x - mu) * jax.lax.rsqrt(var + 1e-5) * w + b

    xn = ln(x, params["ln1_w"][0], params["ln1_b"][0])
    qkv = xn @ params["wqkv"]                                    # (B, N, 3C)
    qkv = qkv.reshape(B, N, 3, num_heads, head_dim).transpose(2, 0, 3, 1, 4)
    q, k, v = qkv[0], qkv[1], qkv[2]                             # (B, h, N, hd)
    attn = (q @ jnp.swapaxes(k, -2, -1)) * scale
    attn = jax.nn.softmax(attn, axis=-1)
    ao = (attn @ v).transpose(0, 2, 1, 3).reshape(B, N, C)
    x1 = x + (ao @ params["wproj"] + params["bproj"][0])
    xn2 = ln(x1, params["ln2_w"][0], params["ln2_b"][0])
    h1 = xn2 @ params["w1"] + params["b1"][0]
    g = 0.5 * h1 * (1.0 + jax.lax.erf(h1 / math.sqrt(2.0)))
    return x1 + (g @ params["w2"] + params["b2"][0])


if __name__ == "__main__":
    B, N, C = 2, 16, 32
    num_heads = 4
    mlp_ratio = 4.0
    H_mlp = int(C * mlp_ratio)

    key = jax.random.PRNGKey(0)
    keys = jax.random.split(key, 8)

    params = {
        "ln1_w": jnp.ones((1, C), jnp.float32),
        "ln1_b": jnp.zeros((1, C), jnp.float32),
        "wqkv": 0.02 * jax.random.normal(keys[0], (C, 3 * C), jnp.float32),
        "wproj": 0.02 * jax.random.normal(keys[1], (C, C), jnp.float32),
        "bproj": 0.02 * jax.random.normal(keys[2], (1, C), jnp.float32),
        "ln2_w": jnp.ones((1, C), jnp.float32),
        "ln2_b": jnp.zeros((1, C), jnp.float32),
        "w1": 0.02 * jax.random.normal(keys[3], (C, H_mlp), jnp.float32),
        "b1": 0.02 * jax.random.normal(keys[4], (1, H_mlp), jnp.float32),
        "w2": 0.02 * jax.random.normal(keys[5], (H_mlp, C), jnp.float32),
        "b2": 0.02 * jax.random.normal(keys[6], (1, C), jnp.float32),
    }

    x = jax.random.normal(keys[7], (B, N, C), jnp.float32)

    # one-time weight preparation (hoisted out of the forward hot path)
    prep = prepare_params(params, num_heads=num_heads)

    out = block_forward(x, prep, num_heads=num_heads)
    jax.block_until_ready(out)

    ref = block_reference(x, params, num_heads=num_heads)
    # bf16 MXU inputs + approx reciprocal => relaxed tolerance vs the f32 reference
    assert jnp.allclose(out, ref, atol=2e-2, rtol=2e-2), "mismatch vs JAX reference"

    print("KERNEL_OK")
</pallas_src>

<mosaic_0001>
module attributes {stable_mosaic.version = 11 : i64} {
  func.func @block_kernel(%arg0: i32, %arg1: memref<1x16x32xf32, #tpu.memory_space<vmem>>, %arg2: memref<32x1xf32, #tpu.memory_space<vmem>>, %arg3: memref<32x1xf32, #tpu.memory_space<vmem>>, %arg4: memref<96x32xbf16, #tpu.memory_space<vmem>>, %arg5: memref<32x32xbf16, #tpu.memory_space<vmem>>, %arg6: memref<32x1xf32, #tpu.memory_space<vmem>>, %arg7: memref<32x1xf32, #tpu.memory_space<vmem>>, %arg8: memref<32x1xf32, #tpu.memory_space<vmem>>, %arg9: memref<128x32xbf16, #tpu.memory_space<vmem>>, %arg10: memref<128x1xf32, #tpu.memory_space<vmem>>, %arg11: memref<32x128xbf16, #tpu.memory_space<vmem>>, %arg12: memref<32x1xf32, #tpu.memory_space<vmem>>, %arg13: memref<1x16x32xf32, #tpu.memory_space<vmem>>) attributes {dimension_semantics = [#tpu.dimension_semantics<parallel>], iteration_bounds = array<i64: 2>, scalar_prefetch = 0 : i64, scratch_operands = 0 : i64, tpu.core_type = #tpu.core_type<tc>, window_params = [{transform_indices = @transform_0, window_bounds = array<i64: 1, 16, 32>}, {pipeline_mode = #tpu.pipeline_mode<synchronous>, transform_indices = @transform_1, window_bounds = array<i64: 32, 1>}, {pipeline_mode = #tpu.pipeline_mode<synchronous>, transform_indices = @transform_2, window_bounds = array<i64: 32, 1>}, {pipeline_mode = #tpu.pipeline_mode<synchronous>, transform_indices = @transform_3, window_bounds = array<i64: 96, 32>}, {pipeline_mode = #tpu.pipeline_mode<synchronous>, transform_indices = @transform_4, window_bounds = array<i64: 32, 32>}, {pipeline_mode = #tpu.pipeline_mode<synchronous>, transform_indices = @transform_5, window_bounds = array<i64: 32, 1>}, {pipeline_mode = #tpu.pipeline_mode<synchronous>, transform_indices = @transform_6, window_bounds = array<i64: 32, 1>}, {pipeline_mode = #tpu.pipeline_mode<synchronous>, transform_indices = @transform_7, window_bounds = array<i64: 32, 1>}, {pipeline_mode = #tpu.pipeline_mode<synchronous>, transform_indices = @transform_8, window_bounds = array<i64: 128, 32>}, {pipeline_mode = #tpu.pipeline_mode<synchronous>, transform_indices = @transform_9, window_bounds = array<i64: 128, 1>}, {pipeline_mode = #tpu.pipeline_mode<synchronous>, transform_indices = @transform_10, window_bounds = array<i64: 32, 128>}, {pipeline_mode = #tpu.pipeline_mode<synchronous>, transform_indices = @transform_11, window_bounds = array<i64: 32, 1>}, {transform_indices = @transform_12, window_bounds = array<i64: 1, 16, 32>}]} {
    %c0 = arith.constant 0 : index
    %c0_0 = arith.constant 0 : index
    %c0_1 = arith.constant 0 : index
    %0 = vector.load %arg1[%c0, %c0_0, %c0_1] : memref<1x16x32xf32, #tpu.memory_space<vmem>>, vector<1x16x32xf32>
    %1 = vector.shape_cast %0 : vector<1x16x32xf32> to vector<16x32xf32>
    %2 = tpu.transpose %1, [1, 0] : vector<16x32xf32> -> vector<32x16xf32>
    %c0_2 = arith.constant 0 : index
    %c0_3 = arith.constant 0 : index
    %3 = vector.load %arg2[%c0_2, %c0_3] : memref<32x1xf32, #tpu.memory_space<vmem>>, vector<32x1xf32>
    %c0_4 = arith.constant 0 : index
    %c0_5 = arith.constant 0 : index
    %4 = vector.load %arg3[%c0_4, %c0_5] : memref<32x1xf32, #tpu.memory_space<vmem>>, vector<32x1xf32>
    %cst = arith.constant dense<0.000000e+00> : vector<16xf32>
    %5 = vector.multi_reduction <add>, %2, %cst [0] : vector<32x16xf32> to vector<16xf32>
    %6 = vector.shape_cast %5 : vector<16xf32> to vector<1x16xf32>
    %cst_6 = arith.constant 3.200000e+01 : f32
    %7 = vector.broadcast %cst_6 : f32 to vector<1x16xf32>
    %8 = arith.divf %6, %7 : vector<1x16xf32>
    %9 = vector.broadcast %8 : vector<1x16xf32> to vector<32x16xf32>
    %10 = arith.subf %2, %9 : vector<32x16xf32>
    %11 = arith.mulf %10, %10 : vector<32x16xf32>
    %cst_7 = arith.constant dense<0.000000e+00> : vector<16xf32>
    %12 = vector.multi_reduction <add>, %11, %cst_7 [0] : vector<32x16xf32> to vector<16xf32>
    %13 = vector.shape_cast %12 : vector<16xf32> to vector<1x16xf32>
    %cst_8 = arith.constant 3.200000e+01 : f32
    %14 = vector.broadcast %cst_8 : f32 to vector<1x16xf32>
    %15 = arith.divf %13, %14 : vector<1x16xf32>
    %16 = vector.broadcast %8 : vector<1x16xf32> to vector<32x16xf32>
    %17 = arith.subf %2, %16 : vector<32x16xf32>
    %cst_9 = arith.constant 9.99999974E-6 : f32
    %18 = vector.broadcast %cst_9 : f32 to vector<1x16xf32>
    %19 = arith.addf %15, %18 : vector<1x16xf32>
    %20 = math.rsqrt %19 : vector<1x16xf32>
    %21 = vector.broadcast %20 : vector<1x16xf32> to vector<32x16xf32>
    %22 = arith.mulf %17, %21 : vector<32x16xf32>
    %23 = vector.broadcast %3 : vector<32x1xf32> to vector<32x16xf32>
    %24 = arith.mulf %22, %23 : vector<32x16xf32>
    %25 = vector.broadcast %4 : vector<32x1xf32> to vector<32x16xf32>
    %26 = arith.addf %24, %25 : vector<32x16xf32>
    %c0_10 = arith.constant 0 : index
    %c0_11 = arith.constant 0 : index
    %27 = vector.load %arg4[%c0_10, %c0_11] : memref<96x32xbf16, #tpu.memory_space<vmem>>, vector<96x32xbf16>
    %28 = arith.truncf %26 : vector<32x16xf32> to vector<32x16xbf16>
    %cst_12 = arith.constant dense<0.000000e+00> : vector<96x16xf32>
    %29 = tpu.matmul %27, %28, %cst_12 {dimension_numbers = #tpu.dot_dimension_numbers<[1], [0], [0], [1], [0, 0, 1, 1], [], []>} : vector<96x32xbf16>, vector<32x16xbf16>, vector<96x16xf32> -> vector<96x16xf32>
    %30 = vector.extract_strided_slice %29 {offsets = [0, 0], sizes = [8, 16], strides = [1, 1]} : vector<96x16xf32> to vector<8x16xf32>
    %31 = tpu.transpose %30, [1, 0] : vector<8x16xf32> -> vector<16x8xf32>
    %32 = vector.extract_strided_slice %29 {offsets = [32, 0], sizes = [8, 16], strides = [1, 1]} : vector<96x16xf32> to vector<8x16xf32>
    %33 = vector.extract_strided_slice %29 {offsets = [64, 0], sizes = [8, 16], strides = [1, 1]} : vector<96x16xf32> to vector<8x16xf32>
    %34 = vector.extract_strided_slice %29 {offsets = [8, 0], sizes = [8, 16], strides = [1, 1]} : vector<96x16xf32> to vector<8x16xf32>
    %35 = tpu.transpose %34, [1, 0] : vector<8x16xf32> -> vector<16x8xf32>
    %36 = vector.extract_strided_slice %29 {offsets = [40, 0], sizes = [8, 16], strides = [1, 1]} : vector<96x16xf32> to vector<8x16xf32>
    %37 = vector.extract_strided_slice %29 {offsets = [72, 0], sizes = [8, 16], strides = [1, 1]} : vector<96x16xf32> to vector<8x16xf32>
    %38 = vector.extract_strided_slice %29 {offsets = [16, 0], sizes = [8, 16], strides = [1, 1]} : vector<96x16xf32> to vector<8x16xf32>
    %39 = tpu.transpose %38, [1, 0] : vector<8x16xf32> -> vector<16x8xf32>
    %40 = vector.extract_strided_slice %29 {offsets = [48, 0], sizes = [8, 16], strides = [1, 1]} : vector<96x16xf32> to vector<8x16xf32>
    %41 = vector.extract_strided_slice %29 {offsets = [80, 0], sizes = [8, 16], strides = [1, 1]} : vector<96x16xf32> to vector<8x16xf32>
    %42 = vector.extract_strided_slice %29 {offsets = [24, 0], sizes = [8, 16], strides = [1, 1]} : vector<96x16xf32> to vector<8x16xf32>
    %43 = tpu.transpose %42, [1, 0] : vector<8x16xf32> -> vector<16x8xf32>
    %44 = vector.extract_strided_slice %29 {offsets = [56, 0], sizes = [8, 16], strides = [1, 1]} : vector<96x16xf32> to vector<8x16xf32>
    %45 = vector.extract_strided_slice %29 {offsets = [88, 0], sizes = [8, 16], strides = [1, 1]} : vector<96x16xf32> to vector<8x16xf32>
    %46 = vector.shape_cast %31 : vector<16x8xf32> to vector<1x16x8xf32>
    %47 = vector.shape_cast %35 : vector<16x8xf32> to vector<1x16x8xf32>
    %48 = vector.shape_cast %39 : vector<16x8xf32> to vector<1x16x8xf32>
    %49 = vector.shape_cast %43 : vector<16x8xf32> to vector<1x16x8xf32>
    %50 = tpu.concatenate %46, %47, %48, %49 in 0 : vector<1x16x8xf32>, vector<1x16x8xf32>, vector<1x16x8xf32>, vector<1x16x8xf32> -> vector<4x16x8xf32>
    %51 = arith.truncf %50 : vector<4x16x8xf32> to vector<4x16x8xbf16>
    %52 = vector.shape_cast %32 : vector<8x16xf32> to vector<1x8x16xf32>
    %53 = vector.shape_cast %36 : vector<8x16xf32> to vector<1x8x16xf32>
    %54 = vector.shape_cast %40 : vector<8x16xf32> to vector<1x8x16xf32>
    %55 = vector.shape_cast %44 : vector<8x16xf32> to vector<1x8x16xf32>
    %56 = tpu.concatenate %52, %53, %54, %55 in 0 : vector<1x8x16xf32>, vector<1x8x16xf32>, vector<1x8x16xf32>, vector<1x8x16xf32> -> vector<4x8x16xf32>
    %57 = arith.truncf %56 : vector<4x8x16xf32> to vector<4x8x16xbf16>
    %58 = vector.shape_cast %33 : vector<8x16xf32> to vector<1x8x16xf32>
    %59 = vector.shape_cast %37 : vector<8x16xf32> to vector<1x8x16xf32>
    %60 = vector.shape_cast %41 : vector<8x16xf32> to vector<1x8x16xf32>
    %61 = vector.shape_cast %45 : vector<8x16xf32> to vector<1x8x16xf32>
    %62 = tpu.concatenate %58, %59, %60, %61 in 0 : vector<1x8x16xf32>, vector<1x8x16xf32>, vector<1x8x16xf32>, vector<1x8x16xf32> -> vector<4x8x16xf32>
    %63 = arith.truncf %62 : vector<4x8x16xf32> to vector<4x8x16xbf16>
    "tpu.trace_start"() <{level = 10 : i32, message = "hid,hdj->hij"}> : () -> ()
    %cst_13 = arith.constant dense<0.000000e+00> : vector<4x16x16xf32>
    %64 = tpu.matmul %51, %57, %cst_13 {dimension_numbers = #tpu.dot_dimension_numbers<[2], [1], [1], [2], [0, 0, 0, 1, 1, 2], [0], [0]>} : vector<4x16x8xbf16>, vector<4x8x16xbf16>, vector<4x16x16xf32> -> vector<4x16x16xf32>
    "tpu.trace_stop"() : () -> ()
    %cst_14 = arith.constant dense<0xFF800000> : vector<4x16xf32>
    %65 = vector.multi_reduction <maximumf>, %64, %cst_14 [2] : vector<4x16x16xf32> to vector<4x16xf32>
    %66 = vector.shape_cast %65 : vector<4x16xf32> to vector<4x16x1xf32>
    %67 = vector.broadcast %66 : vector<4x16x1xf32> to vector<4x16x16xf32>
    %68 = arith.subf %64, %67 : vector<4x16x16xf32>
    %69 = math.exp %68 : vector<4x16x16xf32>
    %70 = arith.truncf %69 : vector<4x16x16xf32> to vector<4x16x16xbf16>
    "tpu.trace_start"() <{level = 10 : i32, message = "hej,hij->hei"}> : () -> ()
    %cst_15 = arith.constant dense<0.000000e+00> : vector<4x8x16xf32>
    %71 = tpu.matmul %63, %70, %cst_15 {dimension_numbers = #tpu.dot_dimension_numbers<[2], [2], [1], [1], [0, 0, 0, 1, 1, 1], [0], [0]>} : vector<4x8x16xbf16>, vector<4x16x16xbf16>, vector<4x8x16xf32> -> vector<4x8x16xf32>
    "tpu.trace_stop"() : () -> ()
    %cst_16 = arith.constant dense<0.000000e+00> : vector<4x16xf32>
    %72 = vector.multi_reduction <add>, %69, %cst_16 [2] : vector<4x16x16xf32> to vector<4x16xf32>
    %73 = tpu.reciprocal %72 {approx = true} : vector<4x16xf32> -> vector<4x16xf32>
    %74 = vector.shape_cast %73 : vector<4x16xf32> to vector<4x1x16xf32>
    %75 = vector.broadcast %74 : vector<4x1x16xf32> to vector<4x8x16xf32>
    %76 = arith.mulf %71, %75 : vector<4x8x16xf32>
    %77 = vector.extract_strided_slice %76 {offsets = [0, 0, 0], sizes = [1, 8, 16], strides = [1, 1, 1]} : vector<4x8x16xf32> to vector<1x8x16xf32>
    %78 = vector.shape_cast %77 : vector<1x8x16xf32> to vector<8x16xf32>
    %79 = vector.extract_strided_slice %76 {offsets = [1, 0, 0], sizes = [1, 8, 16], strides = [1, 1, 1]} : vector<4x8x16xf32> to vector<1x8x16xf32>
    %80 = vector.shape_cast %79 : vector<1x8x16xf32> to vector<8x16xf32>
    %81 = vector.extract_strided_slice %76 {offsets = [2, 0, 0], sizes = [1, 8, 16], strides = [1, 1, 1]} : vector<4x8x16xf32> to vector<1x8x16xf32>
    %82 = vector.shape_cast %81 : vector<1x8x16xf32> to vector<8x16xf32>
    %83 = vector.extract_strided_slice %76 {offsets = [3, 0, 0], sizes = [1, 8, 16], strides = [1, 1, 1]} : vector<4x8x16xf32> to vector<1x8x16xf32>
    %84 = vector.shape_cast %83 : vector<1x8x16xf32> to vector<8x16xf32>
    %85 = tpu.concatenate %78, %80, %82, %84 in 0 : vector<8x16xf32>, vector<8x16xf32>, vector<8x16xf32>, vector<8x16xf32> -> vector<32x16xf32>
    %c0_17 = arith.constant 0 : index
    %c0_18 = arith.constant 0 : index
    %86 = vector.load %arg5[%c0_17, %c0_18] : memref<32x32xbf16, #tpu.memory_space<vmem>>, vector<32x32xbf16>
    %87 = arith.truncf %85 : vector<32x16xf32> to vector<32x16xbf16>
    %cst_19 = arith.constant dense<0.000000e+00> : vector<32x16xf32>
    %88 = tpu.matmul %86, %87, %cst_19 {dimension_numbers = #tpu.dot_dimension_numbers<[1], [0], [0], [1], [0, 0, 1, 1], [], []>} : vector<32x32xbf16>, vector<32x16xbf16>, vector<32x16xf32> -> vector<32x16xf32>
    %c0_20 = arith.constant 0 : index
    %c0_21 = arith.constant 0 : index
    %89 = vector.load %arg6[%c0_20, %c0_21] : memref<32x1xf32, #tpu.memory_space<vmem>>, vector<32x1xf32>
    %90 = vector.broadcast %89 : vector<32x1xf32> to vector<32x16xf32>
    %91 = arith.addf %88, %90 : vector<32x16xf32>
    %92 = arith.addf %2, %91 : vector<32x16xf32>
    %c0_22 = arith.constant 0 : index
    %c0_23 = arith.constant 0 : index
    %93 = vector.load %arg7[%c0_22, %c0_23] : memref<32x1xf32, #tpu.memory_space<vmem>>, vector<32x1xf32>
    %c0_24 = arith.constant 0 : index
    %c0_25 = arith.constant 0 : index
    %94 = vector.load %arg8[%c0_24, %c0_25] : memref<32x1xf32, #tpu.memory_space<vmem>>, vector<32x1xf32>
    %cst_26 = arith.constant dense<0.000000e+00> : vector<16xf32>
    %95 = vector.multi_reduction <add>, %92, %cst_26 [0] : vector<32x16xf32> to vector<16xf32>
    %96 = vector.shape_cast %95 : vector<16xf32> to vector<1x16xf32>
    %cst_27 = arith.constant 3.200000e+01 : f32
    %97 = vector.broadcast %cst_27 : f32 to vector<1x16xf32>
    %98 = arith.divf %96, %97 : vector<1x16xf32>
    %99 = vector.broadcast %98 : vector<1x16xf32> to vector<32x16xf32>
    %100 = arith.subf %92, %99 : vector<32x16xf32>
    %101 = arith.mulf %100, %100 : vector<32x16xf32>
    %cst_28 = arith.constant dense<0.000000e+00> : vector<16xf32>
    %102 = vector.multi_reduction <add>, %101, %cst_28 [0] : vector<32x16xf32> to vector<16xf32>
    %103 = vector.shape_cast %102 : vector<16xf32> to vector<1x16xf32>
    %cst_29 = arith.constant 3.200000e+01 : f32
    %104 = vector.broadcast %cst_29 : f32 to vector<1x16xf32>
    %105 = arith.divf %103, %104 : vector<1x16xf32>
    %106 = vector.broadcast %98 : vector<1x16xf32> to vector<32x16xf32>
    %107 = arith.subf %92, %106 : vector<32x16xf32>
    %cst_30 = arith.constant 9.99999974E-6 : f32
    %108 = vector.broadcast %cst_30 : f32 to vector<1x16xf32>
    %109 = arith.addf %105, %108 : vector<1x16xf32>
    %110 = math.rsqrt %109 : vector<1x16xf32>
    %111 = vector.broadcast %110 : vector<1x16xf32> to vector<32x16xf32>
    %112 = arith.mulf %107, %111 : vector<32x16xf32>
    %113 = vector.broadcast %93 : vector<32x1xf32> to vector<32x16xf32>
    %114 = arith.mulf %112, %113 : vector<32x16xf32>
    %115 = vector.broadcast %94 : vector<32x1xf32> to vector<32x16xf32>
    %116 = arith.addf %114, %115 : vector<32x16xf32>
    %c0_31 = arith.constant 0 : index
    %c0_32 = arith.constant 0 : index
    %117 = vector.load %arg9[%c0_31, %c0_32] : memref<128x32xbf16, #tpu.memory_space<vmem>>, vector<128x32xbf16>
    %118 = arith.truncf %116 : vector<32x16xf32> to vector<32x16xbf16>
    %cst_33 = arith.constant dense<0.000000e+00> : vector<128x16xf32>
    %119 = tpu.matmul %117, %118, %cst_33 {dimension_numbers = #tpu.dot_dimension_numbers<[1], [0], [0], [1], [0, 0, 1, 1], [], []>} : vector<128x32xbf16>, vector<32x16xbf16>, vector<128x16xf32> -> vector<128x16xf32>
    %c0_34 = arith.constant 0 : index
    %c0_35 = arith.constant 0 : index
    %120 = vector.load %arg10[%c0_34, %c0_35] : memref<128x1xf32, #tpu.memory_space<vmem>>, vector<128x1xf32>
    %121 = vector.broadcast %120 : vector<128x1xf32> to vector<128x16xf32>
    %122 = arith.addf %119, %121 : vector<128x16xf32>
    %cst_36 = arith.constant 5.000000e-01 : f32
    %123 = vector.broadcast %cst_36 : f32 to vector<128x16xf32>
    %124 = arith.mulf %123, %122 : vector<128x16xf32>
    %cst_37 = arith.constant 0.707106769 : f32
    %125 = vector.broadcast %cst_37 : f32 to vector<128x16xf32>
    %126 = arith.mulf %122, %125 : vector<128x16xf32>
    %127 = math.erf %126 : vector<128x16xf32>
    %cst_38 = arith.constant 1.000000e+00 : f32
    %128 = vector.broadcast %cst_38 : f32 to vector<128x16xf32>
    %129 = arith.addf %128, %127 : vector<128x16xf32>
    %130 = arith.mulf %124, %129 : vector<128x16xf32>
    %c0_39 = arith.constant 0 : index
    %c0_40 = arith.constant 0 : index
    %131 = vector.load %arg11[%c0_39, %c0_40] : memref<32x128xbf16, #tpu.memory_space<vmem>>, vector<32x128xbf16>
    %132 = arith.truncf %130 : vector<128x16xf32> to vector<128x16xbf16>
    %cst_41 = arith.constant dense<0.000000e+00> : vector<32x16xf32>
    %133 = tpu.matmul %131, %132, %cst_41 {dimension_numbers = #tpu.dot_dimension_numbers<[1], [0], [0], [1], [0, 0, 1, 1], [], []>} : vector<32x128xbf16>, vector<128x16xbf16>, vector<32x16xf32> -> vector<32x16xf32>
    %c0_42 = arith.constant 0 : index
    %c0_43 = arith.constant 0 : index
    %134 = vector.load %arg12[%c0_42, %c0_43] : memref<32x1xf32, #tpu.memory_space<vmem>>, vector<32x1xf32>
    %135 = vector.broadcast %134 : vector<32x1xf32> to vector<32x16xf32>
    %136 = arith.addf %133, %135 : vector<32x16xf32>
    %137 = arith.addf %92, %136 : vector<32x16xf32>
    %138 = tpu.transpose %137, [1, 0] : vector<32x16xf32> -> vector<16x32xf32>
    %c0_44 = arith.constant 0 : index
    %c0_45 = arith.constant 0 : index
    %c0_46 = arith.constant 0 : index
    %139 = vector.load %arg13[%c0_44, %c0_45, %c0_46] : memref<1x16x32xf32, #tpu.memory_space<vmem>>, vector<1x16x32xf32>
    %140 = vector.shape_cast %139 : vector<1x16x32xf32> to vector<16x32xf32>
    %141 = vector.shape_cast %138 : vector<16x32xf32> to vector<1x16x32xf32>
    tpu.vector_store %arg13[%c0_44, %c0_45, %c0_46], %141 {strides = array<i32>} : memref<1x16x32xf32, #tpu.memory_space<vmem>>, vector<1x16x32xf32>,
    return
  }
  func.func @transform_0(%arg0: i32) -> (i32, i32, i32) {
    %c0_i32 = arith.constant 0 : i32
    %c0_i32_0 = arith.constant 0 : i32
    %c0_i32_1 = arith.constant 0 : i32
    return %arg0, %c0_i32, %c0_i32_0 : i32, i32, i32
  }
  func.func @transform_1(%arg0: i32) -> (i32, i32) {
    %c0_i32 = arith.constant 0 : i32
    %c0_i32_0 = arith.constant 0 : i32
    %c0_i32_1 = arith.constant 0 : i32
    return %c0_i32, %c0_i32_0 : i32, i32
  }
  func.func @transform_2(%arg0: i32) -> (i32, i32) {
    %c0_i32 = arith.constant 0 : i32
    %c0_i32_0 = arith.constant 0 : i32
    %c0_i32_1 = arith.constant 0 : i32
    return %c0_i32, %c0_i32_0 : i32, i32
  }
  func.func @transform_3(%arg0: i32) -> (i32, i32) {
    %c0_i32 = arith.constant 0 : i32
    %c0_i32_0 = arith.constant 0 : i32
    %c0_i32_1 = arith.constant 0 : i32
    return %c0_i32, %c0_i32_0 : i32, i32
  }
  func.func @transform_4(%arg0: i32) -> (i32, i32) {
    %c0_i32 = arith.constant 0 : i32
    %c0_i32_0 = arith.constant 0 : i32
    %c0_i32_1 = arith.constant 0 : i32
    return %c0_i32, %c0_i32_0 : i32, i32
  }
  func.func @transform_5(%arg0: i32) -> (i32, i32) {
    %c0_i32 = arith.constant 0 : i32
    %c0_i32_0 = arith.constant 0 : i32
    %c0_i32_1 = arith.constant 0 : i32
    return %c0_i32, %c0_i32_0 : i32, i32
  }
  func.func @transform_6(%arg0: i32) -> (i32, i32) {
    %c0_i32 = arith.constant 0 : i32
    %c0_i32_0 = arith.constant 0 : i32
    %c0_i32_1 = arith.constant 0 : i32
    return %c0_i32, %c0_i32_0 : i32, i32
  }
  func.func @transform_7(%arg0: i32) -> (i32, i32) {
    %c0_i32 = arith.constant 0 : i32
    %c0_i32_0 = arith.constant 0 : i32
    %c0_i32_1 = arith.constant 0 : i32
    return %c0_i32, %c0_i32_0 : i32, i32
  }
  func.func @transform_8(%arg0: i32) -> (i32, i32) {
    %c0_i32 = arith.constant 0 : i32
    %c0_i32_0 = arith.constant 0 : i32
    %c0_i32_1 = arith.constant 0 : i32
    return %c0_i32, %c0_i32_0 : i32, i32
  }
  func.func @transform_9(%arg0: i32) -> (i32, i32) {
    %c0_i32 = arith.constant 0 : i32
    %c0_i32_0 = arith.constant 0 : i32
    %c0_i32_1 = arith.constant 0 : i32
    return %c0_i32, %c0_i32_0 : i32, i32
  }
  func.func @transform_10(%arg0: i32) -> (i32, i32) {
    %c0_i32 = arith.constant 0 : i32
    %c0_i32_0 = arith.constant 0 : i32
    %c0_i32_1 = arith.constant 0 : i32
    return %c0_i32, %c0_i32_0 : i32, i32
  }
  func.func @transform_11(%arg0: i32) -> (i32, i32) {
    %c0_i32 = arith.constant 0 : i32
    %c0_i32_0 = arith.constant 0 : i32
    %c0_i32_1 = arith.constant 0 : i32
    return %c0_i32, %c0_i32_0 : i32, i32
  }
  func.func @transform_12(%arg0: i32) -> (i32, i32, i32) {
    %c0_i32 = arith.constant 0 : i32
    %c0_i32_0 = arith.constant 0 : i32
    %c0_i32_1 = arith.constant 0 : i32
    return %arg0, %c0_i32, %c0_i32_0 : i32, i32, i32
  }
}

</mosaic_0001>

<bundles_post_ra>
// kernel: tpu_custom_call.1
= control target key start
LH: loop header
LB: loop body
LE: loop exit
PB: predicated region body
PF: predicated region fallthrough
CT: control target
= control target key end

     0   :  { %17 = vsyncpa [#allocation3], 0  ;;  %s3082_s0 = inlined_call_operand.vmem [shape: f32[2,16,32], index: 0, kind: input, shape index: {}]   ;;  %s3083_s1 = inlined_call_operand.vmem [shape: f32[32,1], index: 1, kind: input, shape index: {}]   ;;  %s3084_s2 = inlined_call_operand.vmem [shape: f32[32,1], index: 2, kind: input, shape index: {}]   ;;  %s3085_s3 = inlined_call_operand.vmem [shape: bf16[96,32], index: 3, kind: input, shape index: {}]   ;;  %s3086_s4 = inlined_call_operand.vmem [shape: bf16[32,32], index: 4, kind: input, shape index: {}]   ;;  %s3087_s5 = inlined_call_operand.vmem [shape: f32[32,1], index: 5, kind: input, shape index: {}]   ;;  %s3088_s6 = inlined_call_operand.vmem [shape: f32[32,1], index: 6, kind: input, shape index: {}]   ;;  %s3089_s7 = inlined_call_operand.vmem [shape: f32[32,1], index: 7, kind: input, shape index: {}]   ;;  %s3090_s8 = inlined_call_operand.vmem [shape: bf16[128,32], index: 8, kind: input, shape index: {}]   ;;  %s3091_s9 = inlined_call_operand.vmem [shape: f32[128,1], index: 9, kind: input, shape index: {}]   ;;  %s3092_s10 = inlined_call_operand.vmem [shape: bf16[32,128], index: 10, kind: input, shape index: {}]   ;;  %s3093_s11 = inlined_call_operand.vmem [shape: f32[32,1], index: 11, kind: input, shape index: {}]   ;;  %s3094_s12 = inlined_call_operand.hbm [shape: f32[2,16,32], index: 12, kind: output, shape index: {}]  }
   0x1   :  { %19 = vsyncpa [#allocation3 + $0x1], 0  ;;  %s2619_s21 = smov 0   ;;  %s2621_s22 = smov 0  }
   0x2   :  { %s2623_s23 = smov 0   ;;  %s2625_s24 = smov 0  }
   0x3 LB: > { %3096 = sst [smem:[#allocation5_spill]] %s2542_s23  ;;  %s2640_s25 = sadd.s32 4294967295, %s2546_s24   ;;  %s2546_s24 = sphi %s2625_s24, %s3104_s24   ;;  %s2542_s23 = sphi %s2623_s23, %s3101_s23   ;;  %s2538_s22 = sphi %s2621_s22, %s3103_s22   ;;  %s2534_s21 = sphi %s2619_s21, %s3102_s21  }
   0x4   : > { %s2138_s26 = sadd.s32 4294967294, %s2546_s24   ;;  %s2644_s27 = sadd.s32 1, %s2546_s24  }
   0x5   : > { %s289_s28 = sadd.s32 1, %s2542_s23  ;;  %s286_s29 = ssub.s32 %s2546_s24, %s2644_s27 }
   0x6   : > { %p299_p0 = scmp.ne.s32.totalorder %s2542_s23, %s2538_s22  ;;  %p287_p1 = scmp.eq.s32.totalorder %s286_s29, 0 }
   0x7   : > { %p300_p2 = scmp.eq.s32.totalorder %s2640_s25, 1  ;;  %p305_p3 = scmp.ne.s32.totalorder %s2538_s22, %s2534_s21 }
   0x8   : > { %p306_p4 = scmp.eq.s32.totalorder %s2138_s26, 1  ;;  %p2141_p7 = scmp.ge.s32.totalorder %s2546_s24, 1 }
   0x9   : > { %s2655_s30 = scalar_select %p287_p1, %s2542_s23, %s289_s28  }
   0xa   : > { %p2657_p5 = por %p300_p2, %p299_p0  ;;  %p2661_p6 = por %p306_p4, %p305_p3 }
   0xb   : > { %3097 = sst [smem:[#allocation6_spill]] %s2655_s30  ;;  %p365_p8 = scmp.lt.s32.totalorder %s2546_s24, 3 }
   0xd   : > { %p366_p9 = pnand %p2141_p7, %p365_p8 }
   0xe   : > { %p407_p10 = scmp.lt.s32.totalorder (!%p366_p9), %s2640_s25, 1  ;;  %s404_s15 = sand.u32 (!%p366_p9), 1, %s2538_s22  }
   0xf   : > { %369 = sbr.rel (%p366_p9) target bundleno = 2055 (0x807), region = 68  ;;  %s2142_s16 = sshll.u32 (!%p366_p9), %s404_s15, 4 }
  0x10   : > { %s406_s18 = scalar_lea.vmem (!%p366_p9), [#allocation2], %s2142_s16  ;;  %s2193_s19 = sshll.u32 (!%p366_p9), %s2640_s25, 8 }
  0x11   : > { %s3039_s30 = scalar_lea.hbm (!%p366_p9), %s3094_s12, %s2193_s19  ;;  %s3042_s26 = scalar_lea.sflag (!%p366_p9), [#allocation3], %s404_s15 }
  0x14   : > { %v449_v0 = vld [vmem:[%s3083_s1 + $0x10] sm:$0xff]  ;;  %v2548_v1 = vmov 0   ;;  %s408_s17 = scalar_select %p407_p10, %s2640_s25, 1  ;;  %v450_v2 = vld [vmem:[%s3083_s1 + $0x18] sm:$0xff]  ;;  %v447_v6 = vld [vmem:[%s3083_s1] sm:$0xff]  ;;  %vm591_vm0 = vcmask 261120  }
  0x15   : > { %2398 = vset.pattern.permute.xlu1 %v2548_v1  ;;  %v454_v4 = vld [vmem:[%s3084_s2 + $0x18] sm:$0xff]  ;;  %v448_v7 = vld [vmem:[%s3083_s1 + $0x8] sm:$0xff]  ;;  %v451_v8 = vld [vmem:[%s3084_s2] sm:$0xff]  ;;  %vm455_vm1 = vcmask 130048   ;;  %vm2550_vm2 = vmmov 0   ;;  %vm835_vm3 = vcmask 1043456  }
  0x16   : > { %511 = vperm.xlu1 %2398, %v449_v0   ;;  %s2192_s20 = sshll.u32 %s408_s17, 4  ;;  %v452_v9 = vld [vmem:[%s3084_s2 + $0x8] sm:$0xff]  ;;  %v453_v10 = vld [vmem:[%s3084_s2 + $0x10] sm:$0xff]  ;;  %v2400_v11 = vld [vmem:[%s3085_s3] sm:$0xff]   ;;  %vm831_vm4 = vcmask 64512   ;;  %vm1308_vm5 = vcmask 130112  }
  0x17   : > { %s411_s29 = scalar_lea.vmem %s3082_s0, %s2192_s20  ;;  %2246 = vmatprep.mubr.msk.bf16.mxu0 %vm591_vm0, %v2400_v11  ;;  %s2076_s17 = sshll.u32 %s406_s18, 4  ;;  %s3034_s17 = int_to_ptr.vmem [resolvable:$true] %s2076_s17 }
  0x18   : > { %v413_v3 = vld [vmem:[%s411_s29] sm:$0xff]  ;;  %v414_v5 = vld [vmem:[%s411_s29 + $0x8] sm:$0xff]  ;;  %s2486_s28 = scalar_lea.vmem %s3034_s17, 256  ;;  %s2551_s25 = smov [#allocation2]  }
  0x19   : > { %415 = vxpose.xlu0.b32.start [1/2] (short) (narrow) %v413_v3, 32  ;;  %p2487_p11 = scmp.ne.s32.totalorder %s3034_s17, %s2486_s28  ;;  %s2490_s29 = sshll.u32 %s2551_s25, 4  ;;  %s2491_s29 = int_to_ptr.vmem [resolvable:$false] %s2490_s29 }
  0x1a   : > { %516 = vperm.xlu1 %2398, %v450_v2   ;;  %s2492_s16 = scalar_lea.vmem %s2491_s29, 512  ;;  %p2493_p0 = scmp.lt.s32.totalorder %s3034_s17, %s2491_s29 }
  0x1b   : > { %p2488_p12 = pnand %p2487_p11, %p2657_p5  ;;  %p2494_p1 = scmp.lt.s32.totalorder %s2492_s16, %s2486_s28 }
  0x1d   : > { %416 = vxpose.xlu0.b32.end [2/2] (short) (narrow) %v414_v5, 32  ;;  %p2489_p13 = pneg %p2488_p12  ;;  %p2495_p2 = por %p2494_p1, %p2493_p0 }
  0x1e   : > { %540 = vperm.xlu1 %2398, %v454_v4  }
  0x1f   : > { %p2496_p3 = pnand %p2495_p2, %p2489_p13 }
  0x22   : > { %501 = vperm.xlu1 %2398, %v447_v6  }
  0x26   : > { %506 = vperm.xlu1 %2398, %v448_v7  }
  0x2a   : > { %525 = vperm.xlu1 %2398, %v451_v8  }
  0x2e   : > { %530 = vperm.xlu1 %2398, %v452_v9  }
  0x46   : > { %2399 = vset.pattern.permute.xlu0 %v2548_v1 }
  0x4e   : > { %535 = vperm.xlu0 %2399, %v453_v10  }
  0x91   : > { %v512_v44 = vpop.permute.xlu1 %511 }
  0x95   : > { %v2700_v12 = vpop.trf.xlu0  ;;  %v517_v48 = vpop.permute.xlu1 %516 }
  0x96   : > { %v456_v16 = vsel %vm455_vm1, %v2700_v12, 0.0 }
  0x99   : > { %v2702_v13 = vpop.trf.xlu0  ;;  %v541_v52 = vpop.permute.xlu1 %540 }
  0x9a   : > { %v457_v14 = vsel %vm455_vm1, %v2702_v13, 0.0 }
  0x9b   : > { %v458_v18 = vadd.f32 %v457_v14, %v456_v16  ;;  %v2401_v14 = vld [vmem:[%s3085_s3 + $0x8] sm:$0xff]   ;;  %v2402_v16 = vld [vmem:[%s3085_s3 + $0x10] sm:$0xff]  }
  0x9d   : > { %v2706_v15 = vpop.trf.xlu0  ;;  %v502_v56 = vpop.permute.xlu1 %501 }
  0x9e   : > { %v459_v17 = vsel %vm455_vm1, %v2706_v15, 0.0 }
  0x9f   : > { %v460_v19 = vadd.f32 %v459_v17, %v458_v18  ;;  %v2403_v17 = vld [vmem:[%s3085_s3 + $0x18] sm:$0xff]  }
  0xa1   : > { %v2712_v20 = vpop.trf.xlu0  ;;  %v507_v57 = vpop.permute.xlu1 %506 }
  0xa2   : > { %v461_v21 = vsel %vm455_vm1, %v2712_v20, 0.0 }
  0xa3   : > { %v462_v22 = vadd.f32 %v461_v21, %v460_v19  ;;  %v2549_v19 = vmov 0.0  }
  0xa4   : > { %2258 = vmatprep.subr.bf16.mxu1 %v2549_v19  ;;  %2260 = vmatprep.mubr.msk.bf16.mxu1 %vm2550_vm2, %v2549_v19 }
  0xa5   : > { %v463_v23 = vrot.slane %v462_v22, 4  ;;  %v526_v58 = vpop.permute.xlu1 %525 }
  0xa7   : > { %v464_v24 = vadd.f32 %v463_v23, %v462_v22 }
  0xa9   : > { %v465_v25 = vrot.slane %v464_v24, 2  ;;  %v531_v5 = vpop.permute.xlu1 %530 }
  0xab   : > { %v466_v26 = vadd.f32 %v465_v25, %v464_v24 }
  0xad   : > { %v467_v27 = vrot.slane %v466_v26, 1 }
  0xaf   : > { %v468_v28 = vadd.f32 %v467_v27, %v466_v26 }
  0xb1   : > { %v470_v29 = vmul.f32 0.03125, %v468_v28 }
  0xb3   : > { %v474_v30 = vsub.f32 %v2712_v20, %v470_v29  ;;  %v471_v31 = vsub.f32 %v2700_v12, %v470_v29  ;;  %v472_v32 = vsub.f32 %v2702_v13, %v470_v29  ;;  %v473_v33 = vsub.f32 %v2706_v15, %v470_v29 }
  0xb5   : > { %v475_v34 = vmul.f32 %v471_v31, %v471_v31  ;;  %v476_v35 = vmul.f32 %v472_v32, %v472_v32  ;;  %v477_v36 = vmul.f32 %v473_v33, %v473_v33  ;;  %v478_v37 = vmul.f32 %v474_v30, %v474_v30 }
  0xb7   : > { %v479_v38 = vsel %vm455_vm1, %v475_v34, 0.0  ;;  %v480_v39 = vsel %vm455_vm1, %v476_v35, 0.0  ;;  %v482_v41 = vsel %vm455_vm1, %v477_v36, 0.0  ;;  %v484_v43 = vsel %vm455_vm1, %v478_v37, 0.0 }
  0xb8   : > { %v481_v40 = vadd.f32 %v480_v39, %v479_v38 }
  0xba   : > { %v483_v42 = vadd.f32 %v482_v41, %v481_v40 }
  0xbc   : > { %v485_v45 = vadd.f32 %v484_v43, %v483_v42 }
  0xbe   : > { %v486_v46 = vrot.slane %v485_v45, 4 }
  0xc0   : > { %v487_v47 = vadd.f32 %v486_v46, %v485_v45 }
  0xc2   : > { %v488_v49 = vrot.slane %v487_v47, 2 }
  0xc4   : > { %v489_v50 = vadd.f32 %v488_v49, %v487_v47 }
  0xc6   : > { %v490_v51 = vrot.slane %v489_v50, 1 }
  0xc8   : > { %v491_v53 = vadd.f32 %v490_v51, %v489_v50 }
  0xc9   : > { %v536_v0 = vpop.permute.xlu0 %535 }
  0xca   : > { %v492_v54 = vmul.f32 0.03125, %v491_v53 }
  0xcc   : > { %v493_v55 = vadd.f32 1e-05, %v492_v54 }
  0xce   : > { %2418 = vrsqrt.f32 %v493_v55 }
  0xdb   : > { %v2419_v59 = vpop.eup %2418 }
  0xdc   : > { %v497_v60 = vmul.f32 %v2419_v59, %v473_v33  ;;  %v498_v61 = vmul.f32 %v2419_v59, %v474_v30  ;;  %v495_v62 = vmul.f32 %v2419_v59, %v471_v31  ;;  %v496_v63 = vmul.f32 %v2419_v59, %v472_v32  ;;  %v2404_v30 = vld [vmem:[%s3085_s3 + $0x20] sm:$0xff]   ;;  %v2405_v31 = vld [vmem:[%s3085_s3 + $0x28] sm:$0xff]  }
  0xde   : > { %v521_v1 = vmul.f32 %v512_v44, %v497_v60  ;;  %v522_v2 = vmul.f32 %v517_v48, %v498_v61  ;;  %v519_v3 = vmul.f32 %v502_v56, %v495_v62  ;;  %v520_v4 = vmul.f32 %v507_v57, %v496_v63 }
  0xe0   : > { %v546_v6 = vadd.f32 %v541_v52, %v522_v2  ;;  %v543_v7 = vadd.f32 %v526_v58, %v519_v3  ;;  %v544_v8 = vadd.f32 %v531_v5, %v520_v4  ;;  %v545_v9 = vadd.f32 %v536_v0, %v521_v1 }
  0xe2   : > { %v560_v10 = vpack.c.bf16 %v546_v6, %v545_v9  ;;  %v559_v11 = vpack.c.bf16 %v544_v8, %v543_v7 }
  0xe4   : > { %2242 = vmatprep.subr.bf16.mxu0 %v560_v10 }
  0xe5   : > { %2243 = vmatpush3.bf16.msra.mxu0 %v560_v10 }
  0xe6   : > { %2244 = vmatprep.subr.bf16.mxu0 %v559_v11 }
  0xe9   : > { %2245 = vmatpush3.bf16.msra.mxu0 %v559_v11 }
  0xea   : > { %2282 = vmatprep.subr.bf16.mxu0 %v2549_v19 }
  0xec   : > { %2247 = vmatmul.mubr.msk.bf16.vlgmr.msra.gmra.mxu0 %vm591_vm0, %v2401_v14 }
  0xed   : > { %2250 = vmatprep.mubr.msk.bf16.mxu0 %vm591_vm0, %v2402_v16 }
  0xf4   : > { %2251 = vmatmul.mubr.msk.bf16.gmra.mxu0 %vm591_vm0, %v2403_v17 }
  0xf5   : > { %2254 = vmatprep.mubr.msk.bf16.mxu0 %vm591_vm0, %v2404_v30 }
  0xfc   : > { %2255 = vmatmul.mubr.msk.bf16.gmra.mxu0 %vm591_vm0, %v2405_v31 }
  0xfd   : > { %2284 = vmatprep.mubr.msk.bf16.mxu0 %vm2550_vm2, %v2549_v19 }
 0x1ac   : > { %v2248_v18 = vpop.f32.mrf.mxu0 }
 0x1ae   : > { %v644_v21 = vpop.f32.mrf.mxu0 }
 0x1af   : > { %691 = vxpose.xlu1.b32.start.end [1/1] (short) (narrow) %v644_v21, 16 }
 0x1b0   : > { %v2249_v22 = vpop.f32.mrf.mxu0 }
 0x1b2   : > { %v647_v23 = vpop.f32.mrf.mxu0 }
 0x1b3   : > { %723 = vxpose.xlu0.b32.start.end [1/1] (short) (narrow) %v647_v23, 16 }
 0x1b4   : > { %755 = vxpose.xlu1.b32.start.end [1/1] (short) (narrow) %v2248_v18, 16  ;;  %v2252_v24 = vpop.f32.mrf.mxu0 }
 0x1b5   : > { %v825_v25 = vpack.c.bf16 %v2252_v24, %v2252_v24 }
 0x1b6   : > { %v660_v26 = vpop.f32.mrf.mxu0 }
 0x1b7   : > { %v931_v27 = vsel %vm835_vm3, %v825_v25, 0  ;;  %v823_v28 = vpack.c.bf16 %v660_v26, %v660_v26 }
 0x1b8   : > { %v2253_v32 = vpop.f32.mrf.mxu0 }
 0x1b9   : > { %787 = vxpose.xlu1.b32.start.end [1/1] (short) (narrow) %v2249_v22, 16  ;;  %v837_v29 = vsel %vm835_vm3, %v823_v28, 0  ;;  %v826_v44 = vpack.c.bf16 %v2253_v32, %v2253_v32 }
 0x1ba   : > { %2259 = vmatpush3.bf16.msra.mxu1 %v837_v29  ;;  %v663_v33 = vpop.f32.mrf.mxu0 }
 0x1bb   : > { %2264 = vmatprep.subr.bf16.mxu1 %v2549_v19  ;;  %v824_v35 = vpack.c.bf16 %v663_v33, %v663_v33  ;;  %v978_v47 = vsel %vm835_vm3, %v826_v44, 0 }
 0x1bd   : > { %v884_v39 = vsel %vm835_vm3, %v824_v35, 0  ;;  %v2256_v35 = vpop.f32.mrf.mxu0 }
 0x22b   : > { %v707_v34 = vpop.trf.xlu1 }
 0x22f   : > { %v708_v36 = vpop.trf.xlu1  ;;  %v739_v37 = vpop.trf.xlu0 }
 0x230   : > { %v819_v38 = vpack.c.bf16 %v708_v36, %v707_v34 }
 0x232   : > { %2261 = vmatmul.mubr.msk.bf16.vlgmr.msra.gmra.mxu1 %vm831_vm4, %v819_v38 }
 0x233   : > { %2265 = vmatpush3.bf16.msra.mxu1 %v884_v39  ;;  %v771_v40 = vpop.trf.xlu1  ;;  %2266 = vmatprep.mubr.msk.bf16.mxu1 %vm2550_vm2, %v2549_v19  ;;  %v740_v41 = vpop.trf.xlu0 }
 0x234   : > { %2270 = vmatprep.subr.bf16.mxu1 %v2549_v19  ;;  %v820_v42 = vpack.c.bf16 %v740_v41, %v739_v37 }
 0x237   : > { %v772_v43 = vpop.trf.xlu1 }
 0x238   : > { %v821_v46 = vpack.c.bf16 %v772_v43, %v771_v40 }
 0x23a   : > { %2267 = vmatmul.mubr.msk.bf16.vlgmr.msra.gmra.mxu1 %vm831_vm4, %v820_v42  ;;  %v676_v42 = vpop.f32.mrf.mxu0 }
 0x23b   : > { %2271 = vmatpush3.bf16.msra.mxu1 %v931_v27  ;;  %2272 = vmatprep.mubr.msk.bf16.mxu1 %vm2550_vm2, %v2549_v19  ;;  %v803_v45 = vpop.trf.xlu1 }
 0x23c   : > { %2276 = vmatprep.subr.bf16.mxu1 %v2549_v19 }
 0x23f   : > { %v804_v48 = vpop.trf.xlu1 }
 0x240   : > { %v822_v49 = vpack.c.bf16 %v804_v48, %v803_v45 }
 0x242   : > { %2273 = vmatmul.mubr.msk.bf16.vlgmr.msra.gmra.mxu1 %vm831_vm4, %v821_v46 }
 0x243   : > { %2277 = vmatpush3.bf16.msra.mxu1 %v978_v47  ;;  %2278 = vmatprep.mubr.msk.bf16.mxu1 %vm2550_vm2, %v2549_v19  ;;  %v827_v47 = vpack.c.bf16 %v676_v42, %v676_v42  ;;  %v1942_v42 = vld [vmem:[%s3093_s11 + $0x18] sm:$0xff] }
 0x244   : > { %2288 = vmatprep.subr.bf16.mxu1 %v2549_v19 }
 0x24a   : > { %2279 = vmatmul.mubr.msk.bf16.vlgmr.msra.gmra.mxu1 %vm831_vm4, %v822_v49  ;;  %v2257_v49 = vpop.f32.mrf.mxu0 }
 0x24b   : > { %2290 = vmatprep.mubr.msk.bf16.mxu1 %vm2550_vm2, %v2549_v19 }
 0x2f2   : > { %v873_v50 = vpop.f32.mrf.mxu1 }
 0x2f3   : > { %v1021_v51 = vsel %vm455_vm1, %v873_v50, -inf }
 0x2f4   : > { %1022 = vmax.xlane.f32.xlu1 %v1021_v51  ;;  %v2262_v52 = vpop.f32.mrf.mxu1 }
 0x2f6   : > { %v876_v53 = vpop.f32.mrf.mxu1 }
 0x2f7   : > { %v1024_v54 = vsel %vm455_vm1, %v876_v53, -inf }
 0x2f8   : > { %1025 = vmax.xlane.f32.xlu0 %v1024_v54  ;;  %v2263_v55 = vpop.f32.mrf.mxu1  ;;  %v679_v54 = vpop.f32.mrf.mxu0 }
 0x2fa   : > { %v920_v56 = vpop.f32.mrf.mxu1 }
 0x2fb   : > { %v1027_v57 = vsel %vm455_vm1, %v920_v56, -inf }
 0x2fc   : > { %1028 = vmax.xlane.f32.xlu1 %v1027_v57  ;;  %v2268_v58 = vpop.f32.mrf.mxu1 }
 0x2fe   : > { %v923_v59 = vpop.f32.mrf.mxu1 }
 0x2ff   : > { %v1030_v60 = vsel %vm455_vm1, %v923_v59, -inf }
 0x300   : > { %1031 = vmax.xlane.f32.xlu1 %v1030_v60  ;;  %v2269_v61 = vpop.f32.mrf.mxu1 }
 0x302   : > { %v967_v62 = vpop.f32.mrf.mxu1 }
 0x303   : > { %v1033_v63 = vsel %vm455_vm1, %v967_v62, -inf }
 0x304   : > { %1034 = vmax.xlane.f32.xlu1 %v1033_v63  ;;  %v2274_v0 = vpop.f32.mrf.mxu1 }
 0x305   : > { %v829_v0 = vpack.c.bf16 %v2256_v35, %v2256_v35  ;;  %v1592_v35 = vld [vmem:[%s3091_s9 + $0x10] sm:$0xff] }
 0x306   : > { %v970_v1 = vpop.f32.mrf.mxu1 }
 0x307   : > { %v1036_v2 = vsel %vm455_vm1, %v970_v1, -inf }
 0x308   : > { %1037 = vmax.xlane.f32.xlu1 %v1036_v2  ;;  %v2275_v3 = vpop.f32.mrf.mxu1 }
 0x30a   : > { %v1014_v4 = vpop.f32.mrf.mxu1 }
 0x30b   : > { %v1039_v5 = vsel %vm455_vm1, %v1014_v4, -inf }
 0x30c   : > { %1040 = vmax.xlane.f32.xlu0 %v1039_v5  ;;  %v2280_v6 = vpop.f32.mrf.mxu1 }
 0x30d   : > { %v1382_v6 = vld [vmem:[%s3087_s5 + $0x8] sm:$0xff] }
 0x30e   : > { %v1017_v7 = vpop.f32.mrf.mxu1 }
 0x30f   : > { %v1042_v8 = vsel %vm455_vm1, %v1017_v7, -inf }
 0x310   : > { %1043 = vmax.xlane.f32.xlu1 %v1042_v8  ;;  %v2281_v9 = vpop.f32.mrf.mxu1  ;;  %v1383_v8 = vld [vmem:[%s3087_s5 + $0x10] sm:$0xff] }
 0x311   : > { %v1384_v9 = vld [vmem:[%s3087_s5 + $0x18] sm:$0xff] }
 0x37d   : > { %v1023_v10 = vpop.xlane.xlu1 %1022 }
 0x37e   : > { %v1045_v11 = vsub.f32 %v873_v50, %v1023_v10  ;;  %v1476_v10 = vld [vmem:[%s3088_s6 + $0x10] sm:$0xff] }
 0x380   : > { %v1053_v14 = vmul.f32 1.442695, %v1045_v11  ;;  %v1477_v11 = vld [vmem:[%s3088_s6 + $0x18] sm:$0xff] }
 0x381   : > { %v1026_v16 = vpop.xlane.xlu0 %1025 }
 0x382   : > { %2420 = vpow2.f32 %v1053_v14  ;;  %v1046_v17 = vsub.f32 %v876_v53, %v1026_v16  ;;  %v1480_v14 = vld [vmem:[%s3089_s7 + $0x10] sm:$0xff]  ;;  %v1481_v16 = vld [vmem:[%s3089_s7 + $0x18] sm:$0xff] }
 0x384   : > { %v1055_v18 = vmul.f32 1.442695, %v1046_v17  ;;  %v1474_v17 = vld [vmem:[%s3088_s6] sm:$0xff] }
 0x385   : > { %v1029_v21 = vpop.xlane.xlu1 %1028 }
 0x386   : > { %2422 = vpow2.f32 %v1055_v18  ;;  %v1047_v22 = vsub.f32 %v920_v56, %v1029_v21  ;;  %v828_v56 = vpack.c.bf16 %v679_v54, %v679_v54  ;;  %v1475_v18 = vld [vmem:[%s3088_s6 + $0x8] sm:$0xff]  ;;  %v1478_v21 = vld [vmem:[%s3089_s7] sm:$0xff] }
 0x388   : > { %v1057_v23 = vmul.f32 1.442695, %v1047_v22  ;;  %v1479_v22 = vld [vmem:[%s3089_s7 + $0x8] sm:$0xff] }
 0x389   : > { %v1032_v24 = vpop.xlane.xlu1 %1031 }
 0x38a   : > { %v1048_v25 = vsub.f32 %v923_v59, %v1032_v24  ;;  %2424 = vpow2.f32 %v1057_v23  ;;  %v1604_v23 = vld [vmem:[%s3091_s9 + $0x70] sm:$0xff]  ;;  %v1605_v24 = vld [vmem:[%s3091_s9 + $0x78] sm:$0xff] }
 0x38c   : > { %v1059_v26 = vmul.f32 1.442695, %v1048_v25  ;;  %v1602_v25 = vld [vmem:[%s3091_s9 + $0x60] sm:$0xff] }
 0x38d   : > { %v1035_v27 = vpop.xlane.xlu1 %1034 }
 0x38e   : > { %2426 = vpow2.f32 %v1059_v26  ;;  %v1049_v28 = vsub.f32 %v967_v62, %v1035_v27  ;;  %v1603_v26 = vld [vmem:[%s3091_s9 + $0x68] sm:$0xff]  ;;  %v1600_v27 = vld [vmem:[%s3091_s9 + $0x50] sm:$0xff] }
 0x38f   : > { %v2421_v29 = vpop.eup %2420 }
 0x390   : > { %v1061_v30 = vmul.f32 1.442695, %v1049_v28  ;;  %v1257_v31 = vsel %vm455_vm1, %v2421_v29, 0.0  ;;  %v1601_v28 = vld [vmem:[%s3091_s9 + $0x58] sm:$0xff] }
 0x391   : > { %v1038_v32 = vpop.xlane.xlu1 %1037  ;;  %1258 = vadd.xlane.f32.xlu0 %v1257_v31  ;;  %v1596_v31 = vld [vmem:[%s3091_s9 + $0x30] sm:$0xff] }
 0x392   : > { %2428 = vpow2.f32 %v1061_v30  ;;  %v1050_v33 = vsub.f32 %v970_v1, %v1038_v32  ;;  %v1599_v30 = vld [vmem:[%s3091_s9 + $0x48] sm:$0xff]  ;;  %v1597_v32 = vld [vmem:[%s3091_s9 + $0x38] sm:$0xff] }
 0x393   : > { %v2423_v34 = vpop.eup %2422 }
 0x394   : > { %v1063_v36 = vmul.f32 1.442695, %v1050_v33  ;;  %v1260_v37 = vsel %vm455_vm1, %v2423_v34, 0.0  ;;  %v1069_v38 = vpack.c.bf16 %v2423_v34, %v2421_v29  ;;  %v1598_v29 = vld [vmem:[%s3091_s9 + $0x40] sm:$0xff]  ;;  %v1595_v34 = vld [vmem:[%s3091_s9 + $0x28] sm:$0xff] }
 0x395   : > { %v1041_v39 = vpop.xlane.xlu0 %1040  ;;  %1261 = vadd.xlane.f32.xlu1 %v1260_v37  ;;  %v1594_v33 = vld [vmem:[%s3091_s9 + $0x20] sm:$0xff] }
 0x396   : > { %2430 = vpow2.f32 %v1063_v36  ;;  %v1051_v40 = vsub.f32 %v1014_v4, %v1041_v39  ;;  %v1077_v41 = vsel %vm455_vm1, %v1069_v38, 0  ;;  %v1593_v36 = vld [vmem:[%s3091_s9 + $0x18] sm:$0xff]  ;;  %v1590_v37 = vld [vmem:[%s3091_s9] sm:$0xff]  ;;  %v1591_v38 = vld [vmem:[%s3091_s9 + $0x8] sm:$0xff] }
 0x397   : > { %2283 = vmatpush3.bf16.xpose.msra.mxu0 %v1077_v41  ;;  %v2425_v45 = vpop.eup %2424  ;;  %v1939_v39 = vld [vmem:[%s3093_s11] sm:$0xff]  ;;  %v1941_v41 = vld [vmem:[%s3093_s11 + $0x10] sm:$0xff] }
 0x398   : > { %v1065_v43 = vmul.f32 1.442695, %v1051_v40  ;;  %2294 = vmatprep.subr.bf16.mxu0 %v2549_v19  ;;  %v1263_v1 = vsel %vm455_vm1, %v2425_v45, 0.0  ;;  %v1940_v40 = vld [vmem:[%s3093_s11 + $0x8] sm:$0xff] }
 0x399   : > { %v1044_v44 = vpop.xlane.xlu1 %1043 }
 0x39a   : > { %2432 = vpow2.f32 %v1065_v43  ;;  %v1052_v46 = vsub.f32 %v1017_v7, %v1044_v44  ;;  %v1381_v7 = vld [vmem:[%s3087_s5] sm:$0xff] }
 0x39b   : > { %v2427_v48 = vpop.eup %2426  ;;  %v2406_v43 = vld [vmem:[%s3086_s4] sm:$0xff]  }
 0x39c   : > { %v1067_v50 = vmul.f32 1.442695, %v1052_v46  ;;  %v1070_v51 = vpack.c.bf16 %v2427_v48, %v2425_v45  ;;  %v1266_v5 = vsel %vm455_vm1, %v2427_v48, 0.0 }
 0x39e   : > { %2434 = vpow2.f32 %v1067_v50  ;;  %2285 = vmatmul.mubr.msk.bf16.vlgmr.msra.gmra.mxu0 %vm455_vm1, %v827_v47  ;;  %v1123_v52 = vsel %vm455_vm1, %v1070_v51, 0 }
 0x39f   : > { %v2429_v53 = vpop.eup %2428  ;;  %2289 = vmatpush3.bf16.xpose.msra.mxu1 %v1123_v52  ;;  %2296 = vmatprep.mubr.msk.bf16.mxu0 %vm2550_vm2, %v2549_v19 }
 0x3a0   : > { %v1269_v55 = vsel %vm455_vm1, %v2429_v53, 0.0  ;;  %2300 = vmatprep.subr.bf16.mxu1 %v2549_v19 }
 0x3a1   : > { %1270 = vadd.xlane.f32.xlu0 %v1269_v55 }
 0x3a3   : > { %v2431_v57 = vpop.eup %2430 }
 0x3a4   : > { %v1272_v58 = vsel %vm455_vm1, %v2431_v57, 0.0  ;;  %v1071_v59 = vpack.c.bf16 %v2431_v57, %v2429_v53 }
 0x3a5   : > { %1273 = vadd.xlane.f32.xlu1 %v1272_v58 }
 0x3a6   : > { %2291 = vmatmul.mubr.msk.bf16.vlgmr.msra.gmra.mxu1 %vm455_vm1, %v828_v56  ;;  %v1169_v60 = vsel %vm455_vm1, %v1071_v59, 0  ;;  %v1297_v56 = vlaneseq }
 0x3a7   : > { %v2433_v61 = vpop.eup %2432  ;;  %2295 = vmatpush3.bf16.xpose.msra.mxu0 %v1169_v60  ;;  %2302 = vmatprep.mubr.msk.bf16.mxu1 %vm2550_vm2, %v2549_v19  ;;  %v830_v19 = vpack.c.bf16 %v2257_v49, %v2257_v49 }
 0x3a8   : > { %v1275_v62 = vsel %vm455_vm1, %v2433_v61, 0.0  ;;  %v1298_v59 = vand.u32 127, %v1297_v56 }
 0x3a9   : > { %1276 = vadd.xlane.f32.xlu0 %v1275_v62 }
 0x3ab   : > { %v2435_v63 = vpop.eup %2434 }
 0x3ac   : > { %v1278_v2 = vsel %vm455_vm1, %v2435_v63, 0.0  ;;  %v1072_v3 = vpack.c.bf16 %v2435_v63, %v2433_v61  ;;  %v1303_v63 = vadd.s32 4294967288, %v1298_v59 }
 0x3ad   : > { %1264 = vadd.xlane.f32.xlu0 %v1263_v1  ;;  %1279 = vadd.xlane.f32.xlu1 %v1278_v2 }
 0x3ae   : > { %2297 = vmatmul.mubr.msk.bf16.vlgmr.msra.gmra.mxu0 %vm455_vm1, %v829_v0  ;;  %v1215_v4 = vsel %vm455_vm1, %v1072_v3, 0  ;;  %v1300_v3 = vshrl.u32 %v1297_v56, 7 }
 0x3af   : > { %2301 = vmatpush3.bf16.xpose.msra.mxu1 %v1215_v4  ;;  %2310 = vmatprep.mubr.msk.bf16.mxu0 %vm591_vm0, %v2406_v43 }
 0x3b1   : > { %1267 = vadd.xlane.f32.xlu1 %v1266_v5 }
 0x3b6   : > { %2303 = vmatmul.mubr.msk.bf16.vlgmr.msra.gmra.mxu1 %vm455_vm1, %v830_v19 }
 0x3c2   : > { %1392 = vperm.xlu1 %2398, %v1382_v6   ;;  %v1306_v6 = vsub.s32 %v1303_v63, %v1300_v3 }
 0x3c3   : > { %1387 = vperm.xlu0 %2399, %v1381_v7  }
 0x3c6   : > { %1397 = vperm.xlu1 %2398, %v1383_v8  }
 0x3c7   : > { %1402 = vperm.xlu0 %2399, %v1384_v9   ;;  %v1301_v9 = vsub.s32 %v1298_v59, %v1300_v3 }
 0x3ca   : > { %1536 = vperm.xlu1 %2398, %v1476_v10  }
 0x3cb   : > { %1541 = vperm.xlu0 %2399, %v1477_v11  }
 0x3ce   : > { %1560 = vperm.xlu1 %2398, %v1480_v14  }
 0x3cf   : > { %1565 = vperm.xlu0 %2399, %v1481_v16  }
 0x3d2   : > { %1526 = vperm.xlu1 %2398, %v1474_v17  }
 0x3d3   : > { %1531 = vperm.xlu0 %2399, %v1475_v18  }
 0x3d6   : > { %1550 = vperm.xlu1 %2398, %v1478_v21  }
 0x3d7   : > { %1555 = vperm.xlu0 %2399, %v1479_v22  }
 0x3da   : > { %1678 = vperm.xlu1 %2398, %v1604_v23  }
 0x3db   : > { %1683 = vperm.xlu0 %2399, %v1605_v24  }
 0x3de   : > { %1668 = vperm.xlu1 %2398, %v1602_v25  }
 0x3df   : > { %1673 = vperm.xlu0 %2399, %v1603_v26  }
 0x3e2   : > { %1658 = vperm.xlu1 %2398, %v1600_v27  }
 0x3e3   : > { %1663 = vperm.xlu0 %2399, %v1601_v28  }
 0x3e6   : > { %1648 = vperm.xlu1 %2398, %v1598_v29  }
 0x3e7   : > { %1653 = vperm.xlu0 %2399, %v1599_v30  }
 0x3ea   : > { %1638 = vperm.xlu1 %2398, %v1596_v31  }
 0x3eb   : > { %1643 = vperm.xlu0 %2399, %v1597_v32  }
 0x3ee   : > { %1628 = vperm.xlu1 %2398, %v1594_v33  }
 0x3ef   : > { %1633 = vperm.xlu0 %2399, %v1595_v34  }
 0x3f2   : > { %1618 = vperm.xlu1 %2398, %v1592_v35  }
 0x3f3   : > { %1623 = vperm.xlu0 %2399, %v1593_v36  }
 0x3f6   : > { %1608 = vperm.xlu1 %2398, %v1590_v37  }
 0x3f7   : > { %1613 = vperm.xlu0 %2399, %v1591_v38  }
 0x3fa   : > { %1945 = vperm.xlu1 %2398, %v1939_v39  }
 0x3fb   : > { %1950 = vperm.xlu0 %2399, %v1940_v40   ;;  %v2407_v40 = vld [vmem:[%s3086_s4 + $0x8] sm:$0xff]  }
 0x3fe   : > { %1955 = vperm.xlu1 %2398, %v1941_v41   ;;  %v2408_v41 = vld [vmem:[%s3090_s8] sm:$0xff]  }
 0x3ff   : > { %1960 = vperm.xlu0 %2399, %v1942_v42   ;;  %2318 = vmatprep.mubr.msk.bf16.mxu1 %vm591_vm0, %v2408_v41 }
 0x41a   : > { %v1259_v45 = vpop.xlane.xlu0 %1258 }
 0x41e   : > { %v1262_v44 = vpop.xlane.xlu1 %1261 }
 0x41f   : > { %2436 = vrcp.f32 %v1262_v44 }
 0x42a   : > { %v1271_v47 = vpop.xlane.xlu0 %1270 }
 0x42b   : > { %2438 = vrcp.f32 %v1271_v47 }
 0x42c   : > { %v2437_v61 = vpop.eup %2436 }
 0x42d   : > { %v1307_v18 = vrot.slane %v2437_v61, %v1306_v6 }
 0x42e   : > { %v1274_v46 = vpop.xlane.xlu1 %1273 }
 0x42f   : > { %2440 = vrcp.f32 %v1274_v46 }
 0x432   : > { %v1277_v49 = vpop.xlane.xlu0 %1276 }
 0x436   : > { %v1280_v48 = vpop.xlane.xlu1 %1279  ;;  %v1265_v53 = vpop.xlane.xlu0 %1264 }
 0x437   : > { %2442 = vrcp.f32 %v1280_v48 }
 0x438   : > { %v2439_v62 = vpop.eup %2438 }
 0x439   : > { %v1322_v22 = vrot.slane %v2439_v62, %v1301_v9 }
 0x43a   : > { %v1268_v51 = vpop.xlane.xlu1 %1267 }
 0x43b   : > { %2444 = vrcp.f32 %v1268_v51 }
 0x43c   : > { %2446 = vrcp.f32 %v1277_v49  ;;  %v2441_v1 = vpop.eup %2440 }
 0x43d   : > { %2448 = vrcp.f32 %v1265_v53  ;;  %v1326_v11 = vrot.slane %v2441_v1, %v1306_v6 }
 0x43e   : > { %2450 = vrcp.f32 %v1259_v45  ;;  %v1393_v42 = vpop.permute.xlu1 %1392  ;;  %v1388_v43 = vpop.permute.xlu0 %1387 }
 0x43f   : > { %v1327_v27 = vsel %vm1308_vm5, %v1326_v11, %v1322_v22 }
 0x442   : > { %v1398_v47 = vpop.permute.xlu1 %1397 }
 0x444   : > { %v2443_v2 = vpop.eup %2442 }
 0x445   : > { %v1335_v16 = vrot.slane %v2443_v2, %v1306_v6 }
 0x448   : > { %v2445_v5 = vpop.eup %2444 }
 0x449   : > { %v2447_v19 = vpop.eup %2446  ;;  %v1317_v10 = vrot.slane %v2445_v5, %v1306_v6 }
 0x44a   : > { %v2449_v8 = vpop.eup %2448  ;;  %v1331_v24 = vrot.slane %v2447_v19, %v1301_v9 }
 0x44b   : > { %v2451_v17 = vpop.eup %2450  ;;  %v1313_v21 = vrot.slane %v2449_v8, %v1301_v9 }
 0x44c   : > { %v1302_v25 = vrot.slane %v2451_v17, %v1301_v9  ;;  %v1336_v29 = vsel %vm1308_vm5, %v1335_v16, %v1331_v24 }
 0x44d   : > { %v1318_v26 = vsel %vm1308_vm5, %v1317_v10, %v1313_v21 }
 0x44e   : > { %v1309_v33 = vsel %vm1308_vm5, %v1307_v18, %v1302_v25 }
 0x45e   : > { %v1113_v50 = vpop.f32.mrf.mxu0 }
 0x45f   : > { %v1371_v35 = vmul.f32 %v1309_v33, %v1113_v50  ;;  %v1403_v50 = vpop.permute.xlu0 %1402 }
 0x460   : > { %v2286_v52 = vpop.f32.mrf.mxu0 }
 0x462   : > { %v1116_v54 = vpop.f32.mrf.mxu0 }
 0x464   : > { %v2287_v55 = vpop.f32.mrf.mxu0 }
 0x466   : > { %v1159_v57 = vpop.f32.mrf.mxu1 }
 0x467   : > { %v1372_v30 = vmul.f32 %v1318_v26, %v1159_v57 }
 0x468   : > { %v2292_v58 = vpop.f32.mrf.mxu1 }
 0x469   : > { %v1379_v38 = vpack.c.bf16 %v1372_v30, %v1371_v35 }
 0x46a   : > { %v1162_v60 = vpop.f32.mrf.mxu1 }
 0x46c   : > { %v2293_v0 = vpop.f32.mrf.mxu1 }
 0x46e   : > { %v1205_v4 = vpop.f32.mrf.mxu0 }
 0x46f   : > { %v1373_v31 = vmul.f32 %v1327_v27, %v1205_v4 }
 0x470   : > { %v2298_v7 = vpop.f32.mrf.mxu0 }
 0x472   : > { %v1208_v14 = vpop.f32.mrf.mxu0 }
 0x474   : > { %v2299_v23 = vpop.f32.mrf.mxu0 }
 0x476   : > { %v1251_v28 = vpop.f32.mrf.mxu1 }
 0x477   : > { %v1374_v32 = vmul.f32 %v1336_v29, %v1251_v28 }
 0x478   : > { %v2304_v34 = vpop.f32.mrf.mxu1 }
 0x479   : > { %v1380_v36 = vpack.c.bf16 %v1374_v32, %v1373_v31  ;;  %v1542_v31 = vpop.permute.xlu0 %1541  ;;  %v1537_v32 = vpop.permute.xlu1 %1536 }
 0x47a   : > { %v1254_v37 = vpop.f32.mrf.mxu1 }
 0x47b   : > { %2306 = vmatprep.subr.bf16.mxu0 %v1380_v36 }
 0x47c   : > { %v2305_v39 = vpop.f32.mrf.mxu1  ;;  %2307 = vmatpush3.bf16.msra.mxu0 %v1380_v36 }
 0x47d   : > { %2308 = vmatprep.subr.bf16.mxu0 %v1379_v38  ;;  %v1566_v33 = vpop.permute.xlu0 %1565  ;;  %v1561_v34 = vpop.permute.xlu1 %1560 }
 0x480   : > { %2309 = vmatpush3.bf16.msra.mxu0 %v1379_v38 }
 0x481   : > { %v1532_v35 = vpop.permute.xlu0 %1531  ;;  %v1527_v36 = vpop.permute.xlu1 %1526 }
 0x483   : > { %2311 = vmatmul.mubr.msk.bf16.vlgmr.msra.gmra.mxu0 %vm591_vm0, %v2407_v40 }
 0x543   : > { %v2312_v44 = vpop.f32.mrf.mxu0 }
 0x544   : > { %v1464_v49 = vadd.f32 %v2312_v44, %v1398_v47  ;;  %v1551_v47 = vpop.permute.xlu1 %1550 }
 0x545   : > { %v1455_v45 = vpop.f32.mrf.mxu0 }
 0x546   : > { %v1456_v46 = vadd.f32 %v1455_v45, %v1388_v43  ;;  %v2912_v55 = vadd.f32 %v1464_v49, %v2706_v15 }
 0x547   : > { %v2313_v48 = vpop.f32.mrf.mxu0 }
 0x548   : > { %v2909_v52 = vadd.f32 %v1456_v46, %v2700_v12  ;;  %v1467_v53 = vadd.f32 %v2313_v48, %v1403_v50  ;;  %v1485_v12 = vsel %vm455_vm1, %v2912_v55, 0.0  ;;  %v1556_v46 = vpop.permute.xlu0 %1555 }
 0x549   : > { %v1458_v51 = vpop.f32.mrf.mxu0 }
 0x54a   : > { %v1459_v54 = vadd.f32 %v1458_v51, %v1393_v42  ;;  %v1482_v57 = vsel %vm455_vm1, %v2909_v52, 0.0  ;;  %v2920_v58 = vadd.f32 %v1467_v53, %v2712_v20 }
 0x54c   : > { %v2915_v56 = vadd.f32 %v1459_v54, %v2702_v13  ;;  %v1487_v15 = vsel %vm455_vm1, %v2920_v58, 0.0 }
 0x54e   : > { %v1483_v59 = vsel %vm455_vm1, %v2915_v56, 0.0 }
 0x54f   : > { %v1484_v60 = vadd.f32 %v1483_v59, %v1482_v57  ;;  %v2409_v57 = vld [vmem:[%s3090_s8 + $0x8] sm:$0xff]   ;;  %v2410_v59 = vld [vmem:[%s3090_s8 + $0x10] sm:$0xff]  }
 0x551   : > { %v1486_v61 = vadd.f32 %v1485_v12, %v1484_v60  ;;  %v2411_v60 = vld [vmem:[%s3090_s8 + $0x18] sm:$0xff]   ;;  %v2412_v12 = vld [vmem:[%s3090_s8 + $0x20] sm:$0xff]  }
 0x553   : > { %v1488_v62 = vadd.f32 %v1487_v15, %v1486_v61  ;;  %v2413_v61 = vld [vmem:[%s3090_s8 + $0x28] sm:$0xff]   ;;  %v2414_v15 = vld [vmem:[%s3090_s8 + $0x30] sm:$0xff]  }
 0x555   : > { %v1489_v13 = vrot.slane %v1488_v62, 4 }
 0x557   : > { %v1490_v63 = vadd.f32 %v1489_v13, %v1488_v62  ;;  %v2415_v62 = vld [vmem:[%s3090_s8 + $0x38] sm:$0xff]   ;;  %v2416_v13 = vld [vmem:[%s3092_s10] sm:$0xff]  }
 0x558   : > { %2350 = vmatprep.mubr.bf16.mxu0 %v2416_v13 }
 0x559   : > { %v1491_v0 = vrot.slane %v1490_v63, 2 }
 0x55b   : > { %v1492_v1 = vadd.f32 %v1491_v0, %v1490_v63  ;;  %v1684_v0 = vpop.permute.xlu0 %1683 }
 0x55d   : > { %v1493_v2 = vrot.slane %v1492_v1, 1 }
 0x55f   : > { %v1494_v3 = vadd.f32 %v1493_v2, %v1492_v1  ;;  %v1679_v2 = vpop.permute.xlu1 %1678 }
 0x561   : > { %v1495_v20 = vmul.f32 0.03125, %v1494_v3 }
 0x563   : > { %v1496_v4 = vsub.f32 %v2909_v52, %v1495_v20  ;;  %v1497_v5 = vsub.f32 %v2915_v56, %v1495_v20  ;;  %v1498_v19 = vsub.f32 %v2912_v55, %v1495_v20  ;;  %v1499_v6 = vsub.f32 %v2920_v58, %v1495_v20 }
 0x565   : > { %v1500_v7 = vmul.f32 %v1496_v4, %v1496_v4  ;;  %v1501_v8 = vmul.f32 %v1497_v5, %v1497_v5  ;;  %v1502_v9 = vmul.f32 %v1498_v19, %v1498_v19  ;;  %v1503_v10 = vmul.f32 %v1499_v6, %v1499_v6 }
 0x567   : > { %v1504_v11 = vsel %vm455_vm1, %v1500_v7, 0.0  ;;  %v1505_v14 = vsel %vm455_vm1, %v1501_v8, 0.0  ;;  %v1507_v17 = vsel %vm455_vm1, %v1502_v9, 0.0  ;;  %v1509_v21 = vsel %vm455_vm1, %v1503_v10, 0.0 }
 0x568   : > { %v1506_v16 = vadd.f32 %v1505_v14, %v1504_v11 }
 0x56a   : > { %v1508_v18 = vadd.f32 %v1507_v17, %v1506_v16 }
 0x56c   : > { %v1510_v22 = vadd.f32 %v1509_v21, %v1508_v18 }
 0x56e   : > { %v1511_v23 = vrot.slane %v1510_v22, 4 }
 0x570   : > { %v1512_v24 = vadd.f32 %v1511_v23, %v1510_v22 }
 0x572   : > { %v1513_v25 = vrot.slane %v1512_v24, 2 }
 0x574   : > { %v1514_v26 = vadd.f32 %v1513_v25, %v1512_v24 }
 0x576   : > { %v1515_v27 = vrot.slane %v1514_v26, 1 }
 0x578   : > { %v1516_v28 = vadd.f32 %v1515_v27, %v1514_v26 }
 0x57a   : > { %v1517_v29 = vmul.f32 0.03125, %v1516_v28 }
 0x57c   : > { %v1518_v30 = vadd.f32 1e-05, %v1517_v29 }
 0x57e   : > { %2452 = vrsqrt.f32 %v1518_v30 }
 0x58b   : > { %v2453_v37 = vpop.eup %2452 }
 0x58c   : > { %v1521_v38 = vmul.f32 %v2453_v37, %v1497_v5  ;;  %v1522_v39 = vmul.f32 %v2453_v37, %v1498_v19  ;;  %v1523_v40 = vmul.f32 %v2453_v37, %v1499_v6  ;;  %v1520_v41 = vmul.f32 %v2453_v37, %v1496_v4  ;;  %v1674_v4 = vpop.permute.xlu0 %1673  ;;  %v1669_v19 = vpop.permute.xlu1 %1668 }
 0x58e   : > { %v1546_v42 = vmul.f32 %v1537_v32, %v1522_v39  ;;  %v1547_v43 = vmul.f32 %v1542_v31, %v1523_v40  ;;  %v1544_v44 = vmul.f32 %v1527_v36, %v1520_v41  ;;  %v1545_v45 = vmul.f32 %v1532_v35, %v1521_v38 }
 0x590   : > { %v1570_v48 = vadd.f32 %v1561_v34, %v1546_v42  ;;  %v1571_v49 = vadd.f32 %v1566_v33, %v1547_v43  ;;  %v1568_v50 = vadd.f32 %v1551_v47, %v1544_v44  ;;  %v1569_v51 = vadd.f32 %v1556_v46, %v1545_v45  ;;  %v1664_v8 = vpop.permute.xlu0 %1663  ;;  %v1659_v10 = vpop.permute.xlu1 %1658 }
 0x592   : > { %v1589_v53 = vpack.c.bf16 %v1571_v49, %v1570_v48  ;;  %v1588_v54 = vpack.c.bf16 %v1569_v51, %v1568_v50 }
 0x594   : > { %2314 = vmatprep.subr.bf16.mxu1 %v1589_v53  ;;  %v1654_v16 = vpop.permute.xlu0 %1653  ;;  %v1649_v18 = vpop.permute.xlu1 %1648 }
 0x595   : > { %2315 = vmatpush3.bf16.msra.mxu1 %v1589_v53 }
 0x596   : > { %2316 = vmatprep.subr.bf16.mxu1 %v1588_v54 }
 0x598   : > { %v1644_v25 = vpop.permute.xlu0 %1643  ;;  %v1639_v27 = vpop.permute.xlu1 %1638 }
 0x599   : > { %2317 = vmatpush3.bf16.msra.mxu1 %v1588_v54 }
 0x59c   : > { %2319 = vmatmul.mubr.msk.bf16.vlgmr.msra.gmra.mxu1 %vm591_vm0, %v2409_v57  ;;  %v1634_v40 = vpop.permute.xlu0 %1633  ;;  %v1629_v42 = vpop.permute.xlu1 %1628 }
 0x59d   : > { %2322 = vmatprep.mubr.msk.bf16.mxu1 %vm591_vm0, %v2410_v59 }
 0x5a0   : > { %v1624_v50 = vpop.permute.xlu0 %1623  ;;  %v1619_v51 = vpop.permute.xlu1 %1618 }
 0x5a4   : > { %2323 = vmatmul.mubr.msk.bf16.gmra.mxu1 %vm591_vm0, %v2411_v60 }
 0x5a5   : > { %2326 = vmatprep.mubr.msk.bf16.mxu1 %vm591_vm0, %v2412_v12 }
 0x5ac   : > { %2327 = vmatmul.mubr.msk.bf16.gmra.mxu1 %vm591_vm0, %v2413_v61 }
 0x5ad   : > { %2330 = vmatprep.mubr.msk.bf16.mxu1 %vm591_vm0, %v2414_v15 }
 0x5b4   : > { %2331 = vmatmul.mubr.msk.bf16.gmra.mxu1 %vm591_vm0, %v2415_v62  ;;  %v1614_v62 = vpop.permute.xlu0 %1613 }
 0x65c   : > { %v2967_v63 = vpop.f32.mrf.mxu1 }
 0x65d   : > { %v2999_v12 = vadd.f32 %v2967_v63, %v1619_v51 }
 0x65e   : > { %v2969_v1 = vpop.f32.mrf.mxu1 }
 0x660   : > { %v2321_v3 = vpop.f32.mrf.mxu1 }
 0x661   : > { %v2995_v57 = vadd.f32 %v2321_v3, %v1624_v50 }
 0x662   : > { %v2971_v20 = vpop.f32.mrf.mxu1 }
 0x663   : > { %v1866_v13 = vmul.f32 0.70710677, %v2995_v57 }
 0x664   : > { %v2324_v5 = vpop.f32.mrf.mxu1 }
 0x665   : > { %v2986_v46 = vadd.f32 %v2324_v5, %v1639_v27 }
 0x666   : > { %v1800_v6 = vpop.f32.mrf.mxu1 }
 0x667   : > { %v1869_v53 = vmul.f32 0.70710677, %v2986_v46  ;;  %v2993_v54 = vadd.f32 %v1800_v6, %v1629_v42 }
 0x668   : > { %v2325_v7 = vpop.f32.mrf.mxu1 }
 0x669   : > { %v2983_v43 = vadd.f32 %v2325_v7, %v1644_v25  ;;  %v1867_v61 = vmul.f32 0.70710677, %v2993_v54 }
 0x66a   : > { %v1803_v9 = vpop.f32.mrf.mxu1 }
 0x66b   : > { %v1870_v48 = vmul.f32 0.70710677, %v2983_v43  ;;  %v2990_v49 = vadd.f32 %v1803_v9, %v1634_v40  ;;  %v1854_v50 = vmul.f32 0.5, %v2983_v43 }
 0x66c   : > { %v2328_v11 = vpop.f32.mrf.mxu1 }
 0x66d   : > { %v2975_v28 = vadd.f32 %v2328_v11, %v1659_v10  ;;  %v1868_v59 = vmul.f32 0.70710677, %v2990_v49 }
 0x66e   : > { %v1816_v14 = vpop.f32.mrf.mxu1 }
 0x66f   : > { %v1873_v37 = vmul.f32 0.70710677, %v2975_v28  ;;  %v2981_v38 = vadd.f32 %v1816_v14, %v1649_v18 }
 0x670   : > { %v2329_v17 = vpop.f32.mrf.mxu1 }
 0x671   : > { %v2973_v22 = vadd.f32 %v2329_v17, %v1664_v8  ;;  %v1871_v47 = vmul.f32 0.70710677, %v2981_v38 }
 0x672   : > { %v1819_v21 = vpop.f32.mrf.mxu1 }
 0x673   : > { %v1874_v29 = vmul.f32 0.70710677, %v2973_v22  ;;  %v2978_v33 = vadd.f32 %v1819_v21, %v1654_v16 }
 0x674   : > { %v2332_v23 = vpop.f32.mrf.mxu1 }
 0x675   : > { %v1841_v24 = vadd.f32 %v2332_v23, %v1679_v2  ;;  %v1872_v44 = vmul.f32 0.70710677, %v2978_v33  ;;  %v1609_v2 = vpop.permute.xlu1 %1608 }
 0x676   : > { %v1832_v26 = vpop.f32.mrf.mxu1  ;;  %v3008_v63 = vadd.f32 %v2969_v1, %v1609_v2 }
 0x677   : > { %v1877_v30 = vmul.f32 0.70710677, %v1841_v24  ;;  %v1833_v31 = vadd.f32 %v1832_v26, %v1669_v19  ;;  %v1865_v19 = vmul.f32 0.70710677, %v2999_v12  ;;  %v1861_v6 = vmul.f32 0.5, %v1841_v24 }
 0x678   : > { %v2333_v32 = vpop.f32.mrf.mxu1  ;;  %v1863_v1 = vmul.f32 0.70710677, %v3008_v63  ;;  %v1858_v24 = vmul.f32 0.5, %v2973_v22 }
 0x679   : > { %2454 = verf.f32 %v1877_v30  ;;  %v1844_v34 = vadd.f32 %v2333_v32, %v1684_v0  ;;  %v1875_v35 = vmul.f32 0.70710677, %v1833_v31  ;;  %v1859_v21 = vmul.f32 0.5, %v1833_v31 }
 0x67a   : > { %v1835_v36 = vpop.f32.mrf.mxu1  ;;  %2456 = verf.f32 %v1874_v29 }
 0x67b   : > { %v1878_v39 = vmul.f32 0.70710677, %v1844_v34  ;;  %2458 = verf.f32 %v1875_v35  ;;  %v1836_v41 = vadd.f32 %v1835_v36, %v1674_v4  ;;  %v3004_v4 = vadd.f32 %v2971_v20, %v1614_v62 }
 0x67c   : > { %v1862_v7 = vmul.f32 0.5, %v1844_v34  ;;  %v1857_v34 = vmul.f32 0.5, %v2975_v28 }
 0x67d   : > { %2460 = verf.f32 %v1878_v39  ;;  %v1876_v45 = vmul.f32 0.70710677, %v1836_v41  ;;  %v1864_v14 = vmul.f32 0.70710677, %v3004_v4  ;;  %v1860_v23 = vmul.f32 0.5, %v1836_v41 }
 0x67e   : > { %2462 = verf.f32 %v1873_v37  ;;  %v1856_v41 = vmul.f32 0.5, %v2978_v33 }
 0x67f   : > { %2464 = verf.f32 %v1876_v45 }
 0x680   : > { %2466 = verf.f32 %v1872_v44  ;;  %v1855_v44 = vmul.f32 0.5, %v2981_v38 }
 0x681   : > { %2468 = verf.f32 %v1871_v47 }
 0x682   : > { %2470 = verf.f32 %v1870_v48 }
 0x683   : > { %2472 = verf.f32 %v1869_v53 }
 0x684   : > { %2474 = verf.f32 %v1868_v59 }
 0x685   : > { %2476 = verf.f32 %v1867_v61 }
 0x686   : > { %v2455_v60 = vpop.eup %2454  ;;  %2478 = verf.f32 %v1866_v13 }
 0x687   : > { %v2457_v15 = vpop.eup %2456  ;;  %v1909_v3 = vadd.f32 1.0, %v2455_v60  ;;  %2480 = verf.f32 %v1865_v19  ;;  %v1853_v60 = vmul.f32 0.5, %v2986_v46  ;;  %v1850_v46 = vmul.f32 0.5, %v2995_v57 }
 0x688   : > { %v2459_v0 = vpop.eup %2458  ;;  %v1906_v20 = vadd.f32 1.0, %v2457_v15  ;;  %2482 = verf.f32 %v1864_v14 }
 0x689   : > { %v1907_v10 = vadd.f32 1.0, %v2459_v0  ;;  %v1925_v16 = vmul.f32 %v1909_v3, %v1861_v6  ;;  %2484 = verf.f32 %v1863_v1  ;;  %v1852_v0 = vmul.f32 0.5, %v2990_v49 }
 0x68a   : > { %v2461_v5 = vpop.eup %2460  ;;  %v1922_v35 = vmul.f32 %v1906_v20, %v1858_v24  ;;  %v1851_v3 = vmul.f32 0.5, %v2993_v54  ;;  %v1848_v54 = vmul.f32 0.5, %v3004_v4  ;;  %v1951_v24 = vpop.permute.xlu0 %1950 }
 0x68b   : > { %v1910_v8 = vadd.f32 1.0, %v2461_v5  ;;  %v2463_v9 = vpop.eup %2462  ;;  %v1923_v30 = vmul.f32 %v1907_v10, %v1859_v21 }
 0x68c   : > { %v2465_v11 = vpop.eup %2464  ;;  %v1905_v26 = vadd.f32 1.0, %v2463_v9  ;;  %v1849_v9 = vmul.f32 0.5, %v2999_v12  ;;  %v2417_v12 = vld [vmem:[%s3092_s10 + $0x8] sm:$0xff]  }
 0x68d   : > { %v1926_v17 = vmul.f32 %v1910_v8, %v1862_v7  ;;  %v2467_v18 = vpop.eup %2466  ;;  %v1908_v25 = vadd.f32 1.0, %v2465_v11 }
 0x68e   : > { %v2469_v29 = vpop.eup %2468  ;;  %v1904_v36 = vadd.f32 1.0, %v2467_v18  ;;  %v1921_v39 = vmul.f32 %v1905_v26, %v1857_v34 }
 0x68f   : > { %v1938_v27 = vpack.c.bf16 %v1926_v17, %v1925_v16  ;;  %v1924_v32 = vmul.f32 %v1908_v25, %v1860_v23  ;;  %v2471_v37 = vpop.eup %2470  ;;  %v1903_v40 = vadd.f32 1.0, %v2469_v29  ;;  %v1847_v16 = vmul.f32 0.5, %v3008_v63  ;;  %v1946_v25 = vpop.permute.xlu1 %1945 }
 0x690   : > { %v2473_v42 = vpop.eup %2472  ;;  %v1902_v22 = vadd.f32 1.0, %v2471_v37  ;;  %v1920_v45 = vmul.f32 %v1904_v36, %v1856_v41  ;;  %v1936_v47 = vpack.c.bf16 %v1922_v35, %v1921_v39  ;;  %v1961_v35 = vpop.permute.xlu0 %1960 }
 0x691   : > { %2334 = vmatprep.subr.bf16.mxu0 %v1938_v27  ;;  %v1937_v31 = vpack.c.bf16 %v1924_v32, %v1923_v30  ;;  %v2475_v48 = vpop.eup %2474  ;;  %v1901_v28 = vadd.f32 1.0, %v2473_v42  ;;  %v1919_v51 = vmul.f32 %v1903_v40, %v1855_v44 }
 0x692   : > { %2335 = vmatpush3.bf16.msra.mxu0 %v1938_v27  ;;  %v2477_v53 = vpop.eup %2476  ;;  %v1918_v61 = vmul.f32 %v1902_v22, %v1854_v50  ;;  %v1900_v33 = vadd.f32 1.0, %v2475_v48 }
 0x693   : > { %2336 = vmatprep.subr.bf16.mxu0 %v1937_v31  ;;  %v2479_v59 = vpop.eup %2478  ;;  %v1935_v15 = vpack.c.bf16 %v1920_v45, %v1919_v51  ;;  %v1917_v13 = vmul.f32 %v1901_v28, %v1853_v60  ;;  %v1899_v38 = vadd.f32 1.0, %v2477_v53  ;;  %v1956_v30 = vpop.permute.xlu1 %1955 }
 0x694   : > { %v2481_v62 = vpop.eup %2480  ;;  %v1898_v2 = vadd.f32 1.0, %v2479_v59  ;;  %v1916_v43 = vmul.f32 %v1900_v33, %v1852_v0 }
 0x695   : > { %v1934_v5 = vpack.c.bf16 %v1918_v61, %v1917_v13  ;;  %v2483_v19 = vpop.eup %2482  ;;  %v1897_v6 = vadd.f32 1.0, %v2481_v62  ;;  %v1915_v7 = vmul.f32 %v1899_v38, %v1851_v3 }
 0x696   : > { %2337 = vmatpush3.bf16.msra.mxu0 %v1937_v31  ;;  %v2485_v8 = vpop.eup %2484  ;;  %v1914_v10 = vmul.f32 %v1898_v2, %v1850_v46  ;;  %v1896_v11 = vadd.f32 1.0, %v2483_v19 }
 0x697   : > { %2338 = vmatprep.subr.bf16.mxu0 %v1936_v47  ;;  %v1933_v14 = vpack.c.bf16 %v1916_v43, %v1915_v7  ;;  %v1913_v49 = vmul.f32 %v1897_v6, %v1849_v9  ;;  %v1895_v20 = vadd.f32 1.0, %v2485_v8 }
 0x698   : > { %v1912_v17 = vmul.f32 %v1896_v11, %v1848_v54 }
 0x699   : > { %v1932_v18 = vpack.c.bf16 %v1914_v10, %v1913_v49  ;;  %v1911_v57 = vmul.f32 %v1895_v20, %v1847_v16 }
 0x69a   : > { %2339 = vmatpush3.bf16.msra.mxu0 %v1936_v47 }
 0x69b   : > { %2340 = vmatprep.subr.bf16.mxu0 %v1935_v15  ;;  %v1931_v21 = vpack.c.bf16 %v1912_v17, %v1911_v57 }
 0x69e   : > { %2341 = vmatpush3.bf16.msra.mxu0 %v1935_v15 }
 0x69f   : > { %2342 = vmatprep.subr.bf16.mxu0 %v1934_v5 }
 0x6a2   : > { %2343 = vmatpush3.bf16.msra.mxu0 %v1934_v5 }
 0x6a3   : > { %2344 = vmatprep.subr.bf16.mxu0 %v1933_v14 }
 0x6a6   : > { %2345 = vmatpush3.bf16.msra.mxu0 %v1933_v14 }
 0x6a7   : > { %2346 = vmatprep.subr.bf16.mxu0 %v1932_v18 }
 0x6aa   : > { %2347 = vmatpush3.bf16.msra.mxu0 %v1932_v18 }
 0x6ab   : > { %2348 = vmatprep.subr.bf16.mxu0 %v1931_v21 }
 0x6ae   : > { %2349 = vmatpush3.bf16.msra.mxu0 %v1931_v21 }
 0x6b1   : > { %2351 = vmatmul.mubr.bf16.vlgmr.msra.gmra.mxu0 %v2417_v12 }
 0x771   : > { %v2352_v23 = vpop.f32.mrf.mxu0 }
 0x772   : > { %v2018_v32 = vadd.f32 %v2352_v23, %v1956_v30 }
 0x773   : > { %v2009_v4 = vpop.f32.mrf.mxu0 }
 0x774   : > { %v2010_v1 = vadd.f32 %v2009_v4, %v1946_v25  ;;  %v2026_v36 = vadd.f32 %v2018_v32, %v2912_v55 }
 0x775   : > { %v2353_v26 = vpop.f32.mrf.mxu0 }
 0x776   : > { %v2024_v63 = vadd.f32 %v2010_v1, %v2909_v52  ;;  %v2021_v37 = vadd.f32 %v2353_v26, %v1961_v35 }
 0x777   : > { %v2012_v27 = vpop.f32.mrf.mxu0 }
 0x778   : > { %v2013_v29 = vadd.f32 %v2012_v27, %v1951_v24  ;;  %2028 = vxpose.xlu1.b32.start [1/4] (short) (narrow) %v2024_v63, 16  ;;  %v2027_v31 = vadd.f32 %v2021_v37, %v2920_v58 }
 0x77a   : > { %v2025_v34 = vadd.f32 %v2013_v29, %v2915_v56 }
 0x77c   : > { %2029 = vxpose.xlu1.b32.cont [2/4] (short) (narrow) %v2025_v34, 16 }
 0x780   : > { %2030 = vxpose.xlu1.b32.cont [3/4] (short) (narrow) %v2026_v36, 16 }
 0x784   : > { %2031 = vxpose.xlu1.b32.end [4/4] (short) (narrow) %v2027_v31, 16 }
 0x7f4   : > { %v2044_v52 = vpop.trf.xlu1 }
 0x7f5   : > { %2060 = vst.msk [vmem:[%s406_s18] sm:$0xff] %vm591_vm0, %v2044_v52 }
 0x7f8   : > { %v2045_v55 = vpop.trf.xlu1 }
 0x7f9   : > { %2061 = vst.msk [vmem:[%s406_s18 + $0x8] sm:$0xff] %vm591_vm0, %v2045_v55 }
 0x7fa   : > { %2499 = shalt.err (!%p2496_p3)
}
 0x7fb   : > { %s2500_s15 = scalar_lea.hbm %s3039_s30, 256  ;;  %s2504_s20 = scalar_lea.hbm %s3094_s12, 512 }
 0x7fc   : > { %p2501_p4 = scmp.ne.s32.totalorder %s3039_s30, %s2500_s15  ;;  %p2505_p9 = scmp.lt.s32.totalorder %s3039_s30, %s3094_s12 }
 0x7fd   : > { %p2506_p10 = scmp.lt.s32.totalorder %s2504_s20, %s2500_s15 }
 0x7fe   : > { %p2502_p7 = pnand %p2501_p4, %p2657_p5 }
 0x7ff   : > { %p2507_p11 = por %p2506_p10, %p2505_p9 }
 0x800   : > { %p2503_p8 = pneg %p2502_p7 }
 0x802   : > { %p2508_p12 = pnand %p2507_p11, %p2503_p8 }
 0x804   : > { %2511 = shalt.err (!%p2508_p12)
}
 0x805   : > { %s2552_s28 = smov 128   ;;  %s2553_s29 = smov 8  }
 0x806   : > { %2354 = dma.vmem_to_hbm [thread:$0]  (%p2657_p5), %s3034_s17, 256, %s3039_s30, %s3042_s26, %s2552_s28, %s2552_s28, %s2553_s29  }
 0x807 PF: > { %p2360_p13 = scmp.ge.s32.totalorder %s2546_s24, 2  ;;  %s2091_s16 = sand.u32 1, %s2534_s21  }
 0x808   : > { %s2092_s15 = scalar_lea.sflag [#allocation3], %s2091_s16 }
 0x809   : > { %p2357_p0 = pnand %p2360_p13, %p2661_p6 }
 0x80b   : > { %p2358_p1 = pneg %p2357_p0 }
 0x80d   : > { %2529 = dma.done.wait (%p2358_p1), %s2092_s15, 256  }
 0x80e   : > { %2531 = vsyncadd (%p2358_p1), %s2092_s15, 4294967040  ;;  %s3100_s18 = sld [smem:[#allocation5_spill]]  ;;  %p22_p2 = scmp.ge.s32.totalorder %s2644_s27, 4  }
 0x80f   : > { %s3101_s23 = sld [smem:[#allocation6_spill]]  ;;  %s3102_s21 = smov %s2538_s22 }
 0x810   : > { %s3104_s24 = smov %s2644_s27  ;;  %24 = sbr.rel (!%p22_p2) target bundleno = 3 (0x3), region = 103 }
 0x814   : > { %s3103_s22 = smov %s3100_s18 }
 0x815   :  { %2097 = vsyncpa [#allocation3], 1 }
 0x816   :  { %2099 = vsyncpa [#allocation3 + $0x1], 1 }

</bundles_post_ra>
